<compile_context>
chip_gen: v5e
topology: v5e:2x2
jax: 0.10.0
libtpu: 0.0.40
codegen_flags: <defaults>
</compile_context>

<pallas_src>
import functools

import jax
import jax.numpy as jnp
from jax.experimental import pallas as pl
from jax.experimental.pallas import tpu as pltpu

LANE = 128  # lane-dense padding target for narrow dims
_PARALLEL_1D = pltpu.CompilerParams(dimension_semantics=("parallel",))


# ----------------------------------------------------------------------------
# shared conv helper: 'same' 1-D conv over axis 0 as k accumulated MXU matmuls
# on XLU-rolled, edge-masked copies of the f32 VMEM tile (no im2col concat).
# ----------------------------------------------------------------------------
def _same_conv_roll(x32, w_ref, b_row, k):
    """x32: [L, C] f32 value, w_ref: Ref[k, C, Cout] bf16, b_row: [1, Cout] f32."""
    L, C = x32.shape
    pad = (k - 1) // 2
    row = jax.lax.broadcasted_iota(jnp.int32, (L, C), 0)
    acc = b_row
    for j in range(k):
        d = j - pad                               # input offset of this tap
        if d == 0:
            xs = x32
        else:
            xs = pltpu.roll(x32, (-d) % L, 0)     # sublane rotate (XLU slot)
            if d < 0:
                xs = jnp.where(row < -d, 0.0, xs)        # rows that wrapped from end
            else:
                xs = jnp.where(row >= L - d, 0.0, xs)    # rows that wrapped from start
        acc = acc + jnp.dot(xs.astype(w_ref.dtype), w_ref[j],
                            preferred_element_type=jnp.float32)
    return acc                                     # [L, Cout] f32


# ----------------------------------------------------------------------------
# fused text encoder + duration regulator + folded context projection
# (one pallas_call, grid over batch)
# ----------------------------------------------------------------------------
def _text_dur_kernel(emb_ref, style_ref, cw_ref, cb_ref, gw_ref, gb_ref,
                     wt_ref, ws_ref, bin_ref, wh_ref, bh_ref, fw_ref, fb_ref,
                     tf_ref, dur_ref, ctx_ref, *, k):
    # --- text encoder: conv(k rolled matmuls) -> SiLU, gate -> sigmoid, mul ----
    x_bf = emb_ref[0]                                           # [L, E] bf16
    x32 = x_bf.astype(jnp.float32)
    conv = _same_conv_roll(x32, cw_ref, cb_ref[...], k)         # [L, E] f32
    conv = conv * jax.nn.sigmoid(conv)                          # SiLU
    gate = jax.nn.sigmoid(
        jnp.dot(x_bf, gw_ref[...], preferred_element_type=jnp.float32) + gb_ref[...])
    seq = conv * gate                                           # [L, E] f32
    tf_ref[...] = seq[None]

    # --- pooled context through folded (text_proj ∘ ap_ctx) affine map ---------
    pooled = jnp.mean(seq, axis=0, keepdims=True)               # [1, E] f32
    ctx = jnp.dot(pooled.astype(fw_ref.dtype), fw_ref[...],
                  preferred_element_type=jnp.float32) + fb_ref[...]
    ctx_ref[...] = ctx[None]                                    # [1, 1, H]

    # --- duration regulator: split-weight matmul (no concat), ReLU, head ------
    seq_bf = seq.astype(jnp.bfloat16)
    s_bf = style_ref[0].astype(jnp.bfloat16)                    # [1, SP]
    h = (jnp.dot(seq_bf, wt_ref[...], preferred_element_type=jnp.float32)
         + jnp.dot(s_bf, ws_ref[...], preferred_element_type=jnp.float32)
         + bin_ref[...])
    h = jnp.maximum(h, 0.0)
    head = jnp.dot(h.astype(jnp.bfloat16), wh_ref[...],
                   preferred_element_type=jnp.float32) + bh_ref[...]   # [L, Np]

    # epilogue: col 0 = softplus (duration seconds), col 1 = sigmoid (confidence)
    # one shared exp feeds both transcendental chains (single EUP pass).
    e = jnp.exp(-jnp.abs(head))
    sig = jnp.where(head >= 0.0, 1.0, e) / (1.0 + e)
    sp = jnp.maximum(head, 0.0) + jnp.log(1.0 + e)
    col = jax.lax.broadcasted_iota(jnp.int32, head.shape, 1)
    dur_ref[...] = jnp.where(col == 0, sp, sig)[None]


def text_duration_pallas(emb_bf16, style_pad, q, k=3):
    """emb_bf16: [B,L,E] bf16, style_pad: [B,1,128] f32 ->
    (text_features [B,L,E] f32, dur_head [B,L,128] f32, ctx [B,1,H] f32)."""
    B, L, E = emb_bf16.shape
    H = q["ctx_fold_w"].shape[1]
    Dhp = q["dr_wt"].shape[1]
    Np = q["dr_wh"].shape[1]
    SP = style_pad.shape[-1]
    return pl.pallas_call(
        functools.partial(_text_dur_kernel, k=k),
        out_shape=(jax.ShapeDtypeStruct((B, L, E), jnp.float32),
                   jax.ShapeDtypeStruct((B, L, Np), jnp.float32),
                   jax.ShapeDtypeStruct((B, 1, H), jnp.float32)),
        grid=(B,),
        in_specs=[
            pl.BlockSpec((1, L, E), lambda b: (b, 0, 0)),    # token embeddings
            pl.BlockSpec((1, 1, SP), lambda b: (b, 0, 0)),   # padded style
            pl.BlockSpec((k, E, E), lambda b: (0, 0, 0)),    # conv weight (taps)
            pl.BlockSpec((1, E), lambda b: (0, 0)),          # conv bias
            pl.BlockSpec((E, E), lambda b: (0, 0)),          # gate weight
            pl.BlockSpec((1, E), lambda b: (0, 0)),          # gate bias
            pl.BlockSpec((E, Dhp), lambda b: (0, 0)),        # dur W (text part)
            pl.BlockSpec((SP, Dhp), lambda b: (0, 0)),       # dur W (style part)
            pl.BlockSpec((1, Dhp), lambda b: (0, 0)),        # dur bias
            pl.BlockSpec((Dhp, Np), lambda b: (0, 0)),       # dur head W (padded)
            pl.BlockSpec((1, Np), lambda b: (0, 0)),         # dur head b (padded)
            pl.BlockSpec((E, H), lambda b: (0, 0)),          # folded proj∘ctx W
            pl.BlockSpec((1, H), lambda b: (0, 0)),          # folded proj∘ctx b
        ],
        out_specs=(pl.BlockSpec((1, L, E), lambda b: (b, 0, 0)),
                   pl.BlockSpec((1, L, Np), lambda b: (b, 0, 0)),
                   pl.BlockSpec((1, 1, H), lambda b: (b, 0, 0))),
        compiler_params=_PARALLEL_1D,
    )(emb_bf16, style_pad,
      q["te_conv_w"], q["te_conv_b"], q["te_gate_w"], q["te_gate_b"],
      q["dr_wt"], q["dr_ws"], q["dr_bin"], q["dr_wh"], q["dr_bh"],
      q["ctx_fold_w"], q["ctx_fold_b"])


# ----------------------------------------------------------------------------
# fused audio processor: in-kernel one-hot codebook embedding (+sum) -> +ctx ->
# conv (rolled matmuls) -> SiLU -> per-codebook lane-dense heads into [B,C,T,CS]
# ----------------------------------------------------------------------------
def _audio_kernel(at_ref, ctx_ref, emb_ref, cw_ref, cb_ref, hw_ref, hb_ref,
                  out_ref, *, k, num_codebooks, codebook_size):
    toks = at_ref[0]                                            # [T, C] int32
    T = toks.shape[0]
    lane = jax.lax.broadcasted_iota(jnp.int32, (T, codebook_size), 1)

    # codebook embedding "gather" as one-hot matmuls (exact), summed over codebooks
    acc = None
    for c in range(num_codebooks):
        onehot = (lane == toks[:, c:c + 1]).astype(jnp.bfloat16)        # [T, CS]
        t = jnp.dot(onehot, emb_ref[c], preferred_element_type=jnp.float32)
        acc = t if acc is None else acc + t                              # [T, H] f32
    h = acc + ctx_ref[0]                                                 # +[1, H]

    conv = _same_conv_roll(h, cw_ref, cb_ref[...], k)                    # [T, H] f32
    conv = conv * jax.nn.sigmoid(conv)                                   # SiLU
    conv_bf = conv.astype(jnp.bfloat16)

    for c in range(num_codebooks):                                       # lane-dense heads
        logits = jnp.dot(conv_bf, hw_ref[c],
                         preferred_element_type=jnp.float32) + hb_ref[c]
        out_ref[0, c] = logits                                           # [T, CS]


def audio_processor_pallas(audio_tokens_tc, ctx, q, k=3):
    """audio_tokens_tc: [B,T,C] int32, ctx: [B,1,H] f32 -> logits [B,C,T,CS] f32."""
    B, T, C = audio_tokens_tc.shape
    H = q["ap_conv_w"].shape[1]
    CS = q["ap_head_w"].shape[2]
    # TODO(synk): tile T (with a (k-1)/2-row conv halo) and set vmem_limit_bytes
    # for generation-scale T on v7x (64 MiB VMEM); whole-T blocks fit easily here.
    return pl.pallas_call(
        functools.partial(_audio_kernel, k=k, num_codebooks=C, codebook_size=CS),
        out_shape=jax.ShapeDtypeStruct((B, C, T, CS), jnp.float32),
        grid=(B,),
        in_specs=[
            pl.BlockSpec((1, T, C), lambda b: (b, 0, 0)),    # audio tokens
            pl.BlockSpec((1, 1, H), lambda b: (b, 0, 0)),    # folded context
            pl.BlockSpec((C, CS, H), lambda b: (0, 0, 0)),   # codebook embeddings
            pl.BlockSpec((k, H, H), lambda b: (0, 0, 0)),    # conv weight (taps)
            pl.BlockSpec((1, H), lambda b: (0, 0)),          # conv bias
            pl.BlockSpec((C, H, CS), lambda b: (0, 0, 0)),   # head weights
            pl.BlockSpec((C, 1, CS), lambda b: (0, 0, 0)),   # head biases
        ],
        out_specs=pl.BlockSpec((1, C, T, CS), lambda b: (b, 0, 0, 0)),
        compiler_params=_PARALLEL_1D,
    )(audio_tokens_tc, ctx, q["ap_emb"], q["ap_conv_w"], q["ap_conv_b"],
      q["ap_head_w"], q["ap_head_b"])


# ----------------------------------------------------------------------------
# Parameters (deterministic, in-script) + packing for the kernels
# ----------------------------------------------------------------------------
def init_params(key, vocab_size, embed_dim, hidden_dim, num_codebooks,
                codebook_size, style_dim=64, dur_hidden=64):
    keys = iter(jax.random.split(key, 32))

    def nrm(shape, scale=0.02):
        return jax.random.normal(next(keys), shape, jnp.float32) * scale

    p = {}
    # MambaConvTextEncoder(vocab_size, embed_dim)
    p["tok_emb"] = nrm((vocab_size, embed_dim))
    p["te_conv_w"] = nrm((3, embed_dim, embed_dim))
    p["te_conv_b"] = jnp.zeros((embed_dim,), jnp.float32)
    p["te_gate_w"] = nrm((embed_dim, embed_dim))
    p["te_gate_b"] = jnp.zeros((embed_dim,), jnp.float32)
    # text_proj: Linear(embed_dim, hidden_dim)
    p["proj_w"] = nrm((embed_dim, hidden_dim))
    p["proj_b"] = jnp.zeros((hidden_dim,), jnp.float32)
    # DurationRegulator(text_dim=embed_dim, style_dim=64, hidden_dim=64)
    p["dr_in_w"] = nrm((embed_dim + style_dim, dur_hidden))
    p["dr_in_b"] = jnp.zeros((dur_hidden,), jnp.float32)
    p["dr_head_w"] = nrm((dur_hidden, 2))            # [:,0]=duration, [:,1]=confidence
    p["dr_head_b"] = jnp.zeros((2,), jnp.float32)
    # AudioStyleExtractor(hidden_dim, 64)
    p["se_w"] = nrm((hidden_dim, style_dim))
    p["se_b"] = jnp.zeros((style_dim,), jnp.float32)
    # MambaConvAudioProcessor(hidden_dim, num_codebooks, codebook_size)
    p["ap_emb"] = nrm((num_codebooks, codebook_size, hidden_dim))
    p["ap_ctx_w"] = nrm((hidden_dim, hidden_dim))
    p["ap_ctx_b"] = jnp.zeros((hidden_dim,), jnp.float32)
    p["ap_conv_w"] = nrm((3, hidden_dim, hidden_dim))
    p["ap_conv_b"] = jnp.zeros((hidden_dim,), jnp.float32)
    p["ap_head_w"] = nrm((num_codebooks, hidden_dim, codebook_size))
    p["ap_head_b"] = jnp.zeros((num_codebooks, codebook_size), jnp.float32)
    # default_style = Parameter(randn(64) * 0.01)
    p["default_style"] = nrm((style_dim,), 0.01)
    return p


def pack_params(p):
    """Pre-pack / pre-cast / pre-fold weights for the fused kernels (done once)."""
    bf, f32 = jnp.bfloat16, jnp.float32
    E = p["tok_emb"].shape[1]
    H = p["ap_ctx_w"].shape[0]
    C, _, CS = p["ap_head_w"].shape

    def padcols(a, n): return jnp.pad(a, ((0, 0), (0, n - a.shape[1])))
    def padrows(a, n): return jnp.pad(a, ((0, n - a.shape[0]), (0, 0)))

    # lane-pad the 64-wide style/hidden dims and the 2-wide head to 128 so every
    # MXU pass / vector store is lane-dense (zero padding -> exact results).
    dr_wt = padcols(p["dr_in_w"][:E], LANE)
    dr_ws = padcols(padrows(p["dr_in_w"][E:], LANE), LANE)
    dr_bin = padcols(p["dr_in_b"].reshape(1, -1), LANE)
    dr_wh = padcols(padrows(p["dr_head_w"], LANE), LANE)
    dr_bh = padcols(p["dr_head_b"].reshape(1, -1), LANE)

    # fold text_proj into the audio ctx projection (both affine, nothing between):
    # ctx = (pooled @ proj_w + proj_b) @ ap_ctx_w + ap_ctx_b
    fold_w = p["proj_w"] @ p["ap_ctx_w"]
    fold_b = p["proj_b"] @ p["ap_ctx_w"] + p["ap_ctx_b"]

    return {
        "tok_emb": p["tok_emb"].astype(bf),
        "te_conv_w": p["te_conv_w"].astype(bf),                      # [k, E, E]
        "te_conv_b": p["te_conv_b"].reshape(1, E).astype(f32),
        "te_gate_w": p["te_gate_w"].astype(bf),
        "te_gate_b": p["te_gate_b"].reshape(1, E).astype(f32),
        "dr_wt": dr_wt.astype(bf), "dr_ws": dr_ws.astype(bf),
        "dr_bin": dr_bin.astype(f32),
        "dr_wh": dr_wh.astype(bf), "dr_bh": dr_bh.astype(f32),
        "ctx_fold_w": fold_w.astype(bf),
        "ctx_fold_b": fold_b.reshape(1, H).astype(f32),
        # style extractor: pseudo_audio is constant per batch in the reference, so
        # pool+linear collapse to audio_mean * colsum(W) + b (exact, done in XLA).
        "se_colsum": jnp.sum(p["se_w"], axis=0, keepdims=True).astype(f32),
        "se_b": p["se_b"].reshape(1, -1).astype(f32),
        "ap_emb": p["ap_emb"].astype(bf),                            # [C, CS, H]
        "ap_conv_w": p["ap_conv_w"].astype(bf),                      # [k, H, H]
        "ap_conv_b": p["ap_conv_b"].reshape(1, H).astype(f32),
        "ap_head_w": p["ap_head_w"].astype(bf),                      # [C, H, CS]
        "ap_head_b": p["ap_head_b"].reshape(C, 1, CS).astype(f32),
        "default_style": p["default_style"].astype(f32),
    }


# ----------------------------------------------------------------------------
# CleanTTSModel.forward
# ----------------------------------------------------------------------------
def clean_tts_forward(q, text_tokens, audio_tokens=None, tokens_per_second=75.0):
    B, L = text_tokens.shape
    E = q["tok_emb"].shape[1]
    H = q["ctx_fold_w"].shape[1]
    S = q["default_style"].shape[0]

    # --- style ------------------------------------------------------------------
    if audio_tokens is not None:
        audio_mean = jnp.mean(audio_tokens.astype(jnp.float32), axis=(1, 2))   # [B]
        # pseudo_audio = audio_mean expanded over (H, min(T,100)); pooling it back
        # is the identity, so the style linear collapses exactly to:
        style_embedding = jnp.tanh(audio_mean[:, None] * q["se_colsum"] + q["se_b"])
    else:
        style_embedding = jnp.broadcast_to(q["default_style"][None, :], (B, S))
    style_pad = jnp.pad(style_embedding, ((0, 0), (0, LANE - S)))[:, None, :]    # [B,1,128]

    # --- fused text encoder + duration regulator + folded context ---------------
    # NOTE: the reference's text_context = text_proj(encoder(..., False)) is dead
    # (never used or returned) -> removed.
    emb = jnp.take(q["tok_emb"], text_tokens, axis=0)                            # [B,L,E] bf16
    text_features, dur_head, ctx = text_duration_pallas(emb, style_pad, q)
    predicted_durations = dur_head[..., 0]                                       # softplus, seconds
    duration_confidence = dur_head[..., 1]                                       # sigmoid
    duration_tokens = jnp.maximum(
        jnp.round(predicted_durations * tokens_per_second), 1.0).astype(jnp.int32)
    # TODO(synk): true length regulation (repeat-expand by duration_tokens) needs
    # dynamic output shapes; regulated_features passes text_features through.
    regulated_features = text_features

    # --- fused audio processor ---------------------------------------------------
    if audio_tokens is not None:
        # mean(text_proj(regulated_features), dim=1) == text_proj(mean(...)) (affine)
        # and that pooled projection is already folded into `ctx` inside the kernel.
        at_tc = jnp.transpose(audio_tokens, (0, 2, 1))                           # [B,T,C]
        audio_logits = audio_processor_pallas(at_tc, ctx, q)                     # [B,C,T,CS]
    else:
        audio_logits = None

    return {
        "logits": audio_logits,
        "predicted_durations": predicted_durations,
        "duration_tokens": duration_tokens,
        "duration_confidence": duration_confidence,
        "text_features": text_features,
        "regulated_features": regulated_features,
        "style_embedding": style_embedding,
    }


# ----------------------------------------------------------------------------
if __name__ == "__main__":
    # 128-lane-aligned small config consistent with the module constructor.
    vocab_size, embed_dim, hidden_dim = 50, 128, 128
    num_codebooks, codebook_size = 4, 128
    B, L, T = 2, 8, 16

    key = jax.random.PRNGKey(0)
    kp, kt, ka = jax.random.split(key, 3)
    params = init_params(kp, vocab_size, embed_dim, hidden_dim,
                         num_codebooks, codebook_size)
    packed = pack_params(params)

    text_tokens = jax.random.randint(kt, (B, L), 0, vocab_size, dtype=jnp.int32)
    audio_tokens = jax.random.randint(ka, (B, num_codebooks, T), 0,
                                      codebook_size, dtype=jnp.int32)

    fwd = jax.jit(clean_tts_forward)
    out = fwd(packed, text_tokens, audio_tokens)
    for v in jax.tree_util.tree_leaves(out):
        jax.block_until_ready(v)

    assert out["logits"].shape == (B, num_codebooks, T, codebook_size)
    assert out["predicted_durations"].shape == (B, L)
    assert out["duration_tokens"].dtype == jnp.int32
    assert out["duration_confidence"].shape == (B, L)
    assert out["text_features"].shape == (B, L, embed_dim)
    assert out["regulated_features"].shape == (B, L, embed_dim)
    assert out["style_embedding"].shape == (B, 64)
    assert bool(jnp.all(out["predicted_durations"] >= 0.0))
    assert bool(jnp.all((out["duration_confidence"] >= 0.0)
                        & (out["duration_confidence"] <= 1.0)))

    # no-audio branch (default_style path) also exercised
    out2 = fwd(packed, text_tokens, None)
    jax.block_until_ready(out2["predicted_durations"])
    assert out2["logits"] is None
    assert out2["style_embedding"].shape == (B, 64)

    print("KERNEL_OK")
</pallas_src>

<mosaic_0001>
module attributes {stable_mosaic.version = 11 : i64} {
  func.func @_text_dur_kernel(%arg0: i32, %arg1: memref<1x8x128xbf16, #tpu.memory_space<vmem>>, %arg2: memref<1x1x128xf32, #tpu.memory_space<vmem>>, %arg3: memref<3x128x128xbf16, #tpu.memory_space<vmem>>, %arg4: memref<1x128xf32, #tpu.memory_space<vmem>>, %arg5: memref<128x128xbf16, #tpu.memory_space<vmem>>, %arg6: memref<1x128xf32, #tpu.memory_space<vmem>>, %arg7: memref<128x128xbf16, #tpu.memory_space<vmem>>, %arg8: memref<128x128xbf16, #tpu.memory_space<vmem>>, %arg9: memref<1x128xf32, #tpu.memory_space<vmem>>, %arg10: memref<128x128xbf16, #tpu.memory_space<vmem>>, %arg11: memref<1x128xf32, #tpu.memory_space<vmem>>, %arg12: memref<128x128xbf16, #tpu.memory_space<vmem>>, %arg13: memref<1x128xf32, #tpu.memory_space<vmem>>, %arg14: memref<1x8x128xf32, #tpu.memory_space<vmem>>, %arg15: memref<1x8x128xf32, #tpu.memory_space<vmem>>, %arg16: memref<1x1x128xf32, #tpu.memory_space<vmem>>) attributes {dimension_semantics = [#tpu.dimension_semantics<parallel>], iteration_bounds = array<i64: 2>, scalar_prefetch = 0 : i64, scratch_operands = 0 : i64, tpu.core_type = #tpu.core_type<tc>, window_params = [{transform_indices = @transform_0, window_bounds = array<i64: 1, 8, 128>}, {transform_indices = @transform_1, window_bounds = array<i64: 1, 1, 128>}, {pipeline_mode = #tpu.pipeline_mode<synchronous>, transform_indices = @transform_2, window_bounds = array<i64: 3, 128, 128>}, {pipeline_mode = #tpu.pipeline_mode<synchronous>, transform_indices = @transform_3, window_bounds = array<i64: 1, 128>}, {pipeline_mode = #tpu.pipeline_mode<synchronous>, transform_indices = @transform_4, window_bounds = array<i64: 128, 128>}, {pipeline_mode = #tpu.pipeline_mode<synchronous>, transform_indices = @transform_5, window_bounds = array<i64: 1, 128>}, {pipeline_mode = #tpu.pipeline_mode<synchronous>, transform_indices = @transform_6, window_bounds = array<i64: 128, 128>}, {pipeline_mode = #tpu.pipeline_mode<synchronous>, transform_indices = @transform_7, window_bounds = array<i64: 128, 128>}, {pipeline_mode = #tpu.pipeline_mode<synchronous>, transform_indices = @transform_8, window_bounds = array<i64: 1, 128>}, {pipeline_mode = #tpu.pipeline_mode<synchronous>, transform_indices = @transform_9, window_bounds = array<i64: 128, 128>}, {pipeline_mode = #tpu.pipeline_mode<synchronous>, transform_indices = @transform_10, window_bounds = array<i64: 1, 128>}, {pipeline_mode = #tpu.pipeline_mode<synchronous>, transform_indices = @transform_11, window_bounds = array<i64: 128, 128>}, {pipeline_mode = #tpu.pipeline_mode<synchronous>, transform_indices = @transform_12, window_bounds = array<i64: 1, 128>}, {transform_indices = @transform_13, window_bounds = array<i64: 1, 8, 128>}, {transform_indices = @transform_14, window_bounds = array<i64: 1, 8, 128>}, {transform_indices = @transform_15, window_bounds = array<i64: 1, 1, 128>}]} {
    %c0 = arith.constant 0 : index
    %c0_0 = arith.constant 0 : index
    %c0_1 = arith.constant 0 : index
    %0 = vector.load %arg1[%c0, %c0_0, %c0_1] : memref<1x8x128xbf16, #tpu.memory_space<vmem>>, vector<1x8x128xbf16>
    %1 = vector.shape_cast %0 : vector<1x8x128xbf16> to vector<8x128xbf16>
    %2 = arith.extf %1 : vector<8x128xbf16> to vector<8x128xf32>
    %c0_2 = arith.constant 0 : index
    %c0_3 = arith.constant 0 : index
    %3 = vector.load %arg4[%c0_2, %c0_3] : memref<1x128xf32, #tpu.memory_space<vmem>>, vector<1x128xf32>
    %4 = tpu.iota {dimensions = array<i32: 0>} : vector<8x128xi32>
    %c1_i32 = arith.constant 1 : i32
    %5 = tpu.dynamic_rotate %2 by %c1_i32 dim 0 : vector<8x128xf32>, i32 -> vector<8x128xf32>
    %c1_i32_4 = arith.constant 1 : i32
    %6 = vector.broadcast %c1_i32_4 : i32 to vector<8x128xi32>
    %7 = arith.cmpi slt, %4, %6 : vector<8x128xi32>
    %cst = arith.constant 0.000000e+00 : f32
    %8 = vector.broadcast %cst : f32 to vector<8x128xf32>
    %9 = arith.select %7, %8, %5 : vector<8x128xi1>, vector<8x128xf32>
    %10 = arith.truncf %9 : vector<8x128xf32> to vector<8x128xbf16>
    %c0_5 = arith.constant 0 : index
    %c0_6 = arith.constant 0 : index
    %c0_7 = arith.constant 0 : index
    %11 = vector.load %arg3[%c0_5, %c0_6, %c0_7] : memref<3x128x128xbf16, #tpu.memory_space<vmem>>, vector<1x128x128xbf16>
    %12 = vector.shape_cast %11 : vector<1x128x128xbf16> to vector<128x128xbf16>
    %cst_8 = arith.constant dense<0.000000e+00> : vector<8x128xf32>
    %13 = tpu.matmul %10, %12, %cst_8 {dimension_numbers = #tpu.dot_dimension_numbers<[1], [0], [0], [1], [0, 0, 1, 1], [], []>} : vector<8x128xbf16>, vector<128x128xbf16>, vector<8x128xf32> -> vector<8x128xf32>
    %14 = vector.broadcast %3 : vector<1x128xf32> to vector<8x128xf32>
    %15 = arith.addf %14, %13 : vector<8x128xf32>
    %16 = arith.truncf %2 : vector<8x128xf32> to vector<8x128xbf16>
    %c1 = arith.constant 1 : index
    %c0_9 = arith.constant 0 : index
    %c0_10 = arith.constant 0 : index
    %17 = vector.load %arg3[%c1, %c0_9, %c0_10] : memref<3x128x128xbf16, #tpu.memory_space<vmem>>, vector<1x128x128xbf16>
    %18 = vector.shape_cast %17 : vector<1x128x128xbf16> to vector<128x128xbf16>
    %cst_11 = arith.constant dense<0.000000e+00> : vector<8x128xf32>
    %19 = tpu.matmul %16, %18, %cst_11 {dimension_numbers = #tpu.dot_dimension_numbers<[1], [0], [0], [1], [0, 0, 1, 1], [], []>} : vector<8x128xbf16>, vector<128x128xbf16>, vector<8x128xf32> -> vector<8x128xf32>
    %20 = arith.addf %15, %19 : vector<8x128xf32>
    %c7_i32 = arith.constant 7 : i32
    %21 = tpu.dynamic_rotate %2 by %c7_i32 dim 0 : vector<8x128xf32>, i32 -> vector<8x128xf32>
    %c7_i32_12 = arith.constant 7 : i32
    %22 = vector.broadcast %c7_i32_12 : i32 to vector<8x128xi32>
    %23 = arith.cmpi sge, %4, %22 : vector<8x128xi32>
    %cst_13 = arith.constant 0.000000e+00 : f32
    %24 = vector.broadcast %cst_13 : f32 to vector<8x128xf32>
    %25 = arith.select %23, %24, %21 : vector<8x128xi1>, vector<8x128xf32>
    %26 = arith.truncf %25 : vector<8x128xf32> to vector<8x128xbf16>
    %c2 = arith.constant 2 : index
    %c0_14 = arith.constant 0 : index
    %c0_15 = arith.constant 0 : index
    %27 = vector.load %arg3[%c2, %c0_14, %c0_15] : memref<3x128x128xbf16, #tpu.memory_space<vmem>>, vector<1x128x128xbf16>
    %28 = vector.shape_cast %27 : vector<1x128x128xbf16> to vector<128x128xbf16>
    %cst_16 = arith.constant dense<0.000000e+00> : vector<8x128xf32>
    %29 = tpu.matmul %26, %28, %cst_16 {dimension_numbers = #tpu.dot_dimension_numbers<[1], [0], [0], [1], [0, 0, 1, 1], [], []>} : vector<8x128xbf16>, vector<128x128xbf16>, vector<8x128xf32> -> vector<8x128xf32>
    %30 = arith.addf %20, %29 : vector<8x128xf32>
    %31 = arith.negf %30 : vector<8x128xf32>
    %32 = math.exp %31 : vector<8x128xf32>
    %cst_17 = arith.constant 1.000000e+00 : f32
    %33 = vector.broadcast %cst_17 : f32 to vector<8x128xf32>
    %34 = arith.addf %33, %32 : vector<8x128xf32>
    %35 = arith.divf %33, %34 : vector<8x128xf32>
    %36 = arith.mulf %30, %35 : vector<8x128xf32>
    %c0_18 = arith.constant 0 : index
    %c0_19 = arith.constant 0 : index
    %37 = vector.load %arg5[%c0_18, %c0_19] : memref<128x128xbf16, #tpu.memory_space<vmem>>, vector<128x128xbf16>
    %cst_20 = arith.constant dense<0.000000e+00> : vector<8x128xf32>
    %38 = tpu.matmul %1, %37, %cst_20 {dimension_numbers = #tpu.dot_dimension_numbers<[1], [0], [0], [1], [0, 0, 1, 1], [], []>} : vector<8x128xbf16>, vector<128x128xbf16>, vector<8x128xf32> -> vector<8x128xf32>
    %c0_21 = arith.constant 0 : index
    %c0_22 = arith.constant 0 : index
    %39 = vector.load %arg6[%c0_21, %c0_22] : memref<1x128xf32, #tpu.memory_space<vmem>>, vector<1x128xf32>
    %40 = vector.broadcast %39 : vector<1x128xf32> to vector<8x128xf32>
    %41 = arith.addf %38, %40 : vector<8x128xf32>
    %42 = arith.negf %41 : vector<8x128xf32>
    %43 = math.exp %42 : vector<8x128xf32>
    %cst_23 = arith.constant 1.000000e+00 : f32
    %44 = vector.broadcast %cst_23 : f32 to vector<8x128xf32>
    %45 = arith.addf %44, %43 : vector<8x128xf32>
    %46 = arith.divf %44, %45 : vector<8x128xf32>
    %47 = arith.mulf %36, %46 : vector<8x128xf32>
    %48 = vector.shape_cast %47 : vector<8x128xf32> to vector<1x8x128xf32>
    %c0_24 = arith.constant 0 : index
    %c0_25 = arith.constant 0 : index
    %c0_26 = arith.constant 0 : index
    %49 = vector.load %arg14[%c0_24, %c0_25, %c0_26] : memref<1x8x128xf32, #tpu.memory_space<vmem>>, vector<1x8x128xf32>
    tpu.vector_store %arg14[%c0_24, %c0_25, %c0_26], %48 {strides = array<i32>} : memref<1x8x128xf32, #tpu.memory_space<vmem>>, vector<1x8x128xf32>,
    %cst_27 = arith.constant dense<0.000000e+00> : vector<128xf32>
    %50 = vector.multi_reduction <add>, %47, %cst_27 [0] : vector<8x128xf32> to vector<128xf32>
    %51 = vector.shape_cast %50 : vector<128xf32> to vector<1x128xf32>
    %cst_28 = arith.constant 8.000000e+00 : f32
    %52 = vector.broadcast %cst_28 : f32 to vector<1x128xf32>
    %53 = arith.divf %51, %52 : vector<1x128xf32>
    %54 = arith.truncf %53 : vector<1x128xf32> to vector<1x128xbf16>
    %c0_29 = arith.constant 0 : index
    %c0_30 = arith.constant 0 : index
    %55 = vector.load %arg12[%c0_29, %c0_30] : memref<128x128xbf16, #tpu.memory_space<vmem>>, vector<128x128xbf16>
    %cst_31 = arith.constant dense<0.000000e+00> : vector<1x128xf32>
    %56 = tpu.matmul %54, %55, %cst_31 {dimension_numbers = #tpu.dot_dimension_numbers<[1], [0], [0], [1], [0, 0, 1, 1], [], []>} : vector<1x128xbf16>, vector<128x128xbf16>, vector<1x128xf32> -> vector<1x128xf32>
    %c0_32 = arith.constant 0 : index
    %c0_33 = arith.constant 0 : index
    %57 = vector.load %arg13[%c0_32, %c0_33] : memref<1x128xf32, #tpu.memory_space<vmem>>, vector<1x128xf32>
    %58 = arith.addf %56, %57 : vector<1x128xf32>
    %59 = vector.shape_cast %58 : vector<1x128xf32> to vector<1x1x128xf32>
    %c0_34 = arith.constant 0 : index
    %c0_35 = arith.constant 0 : index
    %c0_36 = arith.constant 0 : index
    %60 = vector.load %arg16[%c0_34, %c0_35, %c0_36] : memref<1x1x128xf32, #tpu.memory_space<vmem>>, vector<1x1x128xf32>
    tpu.vector_store %arg16[%c0_34, %c0_35, %c0_36], %59 {strides = array<i32>} : memref<1x1x128xf32, #tpu.memory_space<vmem>>, vector<1x1x128xf32>,
    %61 = arith.truncf %47 : vector<8x128xf32> to vector<8x128xbf16>
    %c0_37 = arith.constant 0 : index
    %c0_38 = arith.constant 0 : index
    %c0_39 = arith.constant 0 : index
    %62 = vector.load %arg2[%c0_37, %c0_38, %c0_39] : memref<1x1x128xf32, #tpu.memory_space<vmem>>, vector<1x1x128xf32>
    %63 = vector.shape_cast %62 : vector<1x1x128xf32> to vector<1x128xf32>
    %64 = arith.truncf %63 : vector<1x128xf32> to vector<1x128xbf16>
    %c0_40 = arith.constant 0 : index
    %c0_41 = arith.constant 0 : index
    %65 = vector.load %arg7[%c0_40, %c0_41] : memref<128x128xbf16, #tpu.memory_space<vmem>>, vector<128x128xbf16>
    %cst_42 = arith.constant dense<0.000000e+00> : vector<8x128xf32>
    %66 = tpu.matmul %61, %65, %cst_42 {dimension_numbers = #tpu.dot_dimension_numbers<[1], [0], [0], [1], [0, 0, 1, 1], [], []>} : vector<8x128xbf16>, vector<128x128xbf16>, vector<8x128xf32> -> vector<8x128xf32>
    %c0_43 = arith.constant 0 : index
    %c0_44 = arith.constant 0 : index
    %67 = vector.load %arg8[%c0_43, %c0_44] : memref<128x128xbf16, #tpu.memory_space<vmem>>, vector<128x128xbf16>
    %cst_45 = arith.constant dense<0.000000e+00> : vector<1x128xf32>
    %68 = tpu.matmul %64, %67, %cst_45 {dimension_numbers = #tpu.dot_dimension_numbers<[1], [0], [0], [1], [0, 0, 1, 1], [], []>} : vector<1x128xbf16>, vector<128x128xbf16>, vector<1x128xf32> -> vector<1x128xf32>
    %69 = vector.broadcast %68 : vector<1x128xf32> to vector<8x128xf32>
    %70 = arith.addf %66, %69 : vector<8x128xf32>
    %c0_46 = arith.constant 0 : index
    %c0_47 = arith.constant 0 : index
    %71 = vector.load %arg9[%c0_46, %c0_47] : memref<1x128xf32, #tpu.memory_space<vmem>>, vector<1x128xf32>
    %72 = vector.broadcast %71 : vector<1x128xf32> to vector<8x128xf32>
    %73 = arith.addf %70, %72 : vector<8x128xf32>
    %cst_48 = arith.constant 0.000000e+00 : f32
    %74 = vector.broadcast %cst_48 : f32 to vector<8x128xf32>
    %75 = arith.maximumf %73, %74 : vector<8x128xf32>
    %76 = arith.truncf %75 : vector<8x128xf32> to vector<8x128xbf16>
    %c0_49 = arith.constant 0 : index
    %c0_50 = arith.constant 0 : index
    %77 = vector.load %arg10[%c0_49, %c0_50] : memref<128x128xbf16, #tpu.memory_space<vmem>>, vector<128x128xbf16>
    %cst_51 = arith.constant dense<0.000000e+00> : vector<8x128xf32>
    %78 = tpu.matmul %76, %77, %cst_51 {dimension_numbers = #tpu.dot_dimension_numbers<[1], [0], [0], [1], [0, 0, 1, 1], [], []>} : vector<8x128xbf16>, vector<128x128xbf16>, vector<8x128xf32> -> vector<8x128xf32>
    %c0_52 = arith.constant 0 : index
    %c0_53 = arith.constant 0 : index
    %79 = vector.load %arg11[%c0_52, %c0_53] : memref<1x128xf32, #tpu.memory_space<vmem>>, vector<1x128xf32>
    %80 = vector.broadcast %79 : vector<1x128xf32> to vector<8x128xf32>
    %81 = arith.addf %78, %80 : vector<8x128xf32>
    %82 = math.absf %81 : vector<8x128xf32>
    %cst_54 = arith.constant 0.000000e+00 : f32
    %83 = vector.broadcast %cst_54 : f32 to vector<8x128xf32>
    %84 = arith.subf %83, %82 : vector<8x128xf32>
    %85 = math.exp %84 : vector<8x128xf32>
    %cst_55 = arith.constant 0.000000e+00 : f32
    %86 = vector.broadcast %cst_55 : f32 to vector<8x128xf32>
    %87 = arith.cmpf oge, %81, %86 : vector<8x128xf32>
    %cst_56 = arith.constant 1.000000e+00 : f32
    %88 = vector.broadcast %cst_56 : f32 to vector<8x128xf32>
    %89 = arith.select %87, %88, %85 : vector<8x128xi1>, vector<8x128xf32>
    %cst_57 = arith.constant 1.000000e+00 : f32
    %90 = vector.broadcast %cst_57 : f32 to vector<8x128xf32>
    %91 = arith.addf %90, %85 : vector<8x128xf32>
    %92 = arith.divf %89, %91 : vector<8x128xf32>
    %cst_58 = arith.constant 0.000000e+00 : f32
    %93 = vector.broadcast %cst_58 : f32 to vector<8x128xf32>
    %94 = arith.maximumf %81, %93 : vector<8x128xf32>
    %cst_59 = arith.constant 1.000000e+00 : f32
    %95 = vector.broadcast %cst_59 : f32 to vector<8x128xf32>
    %96 = arith.addf %95, %85 : vector<8x128xf32>
    %97 = math.log %96 : vector<8x128xf32>
    %98 = arith.addf %94, %97 : vector<8x128xf32>
    %99 = tpu.iota {dimensions = array<i32: 1>} : vector<8x128xi32>
    %c0_i32 = arith.constant 0 : i32
    %100 = vector.broadcast %c0_i32 : i32 to vector<8x128xi32>
    %101 = arith.cmpi eq, %99, %100 : vector<8x128xi32>
    %102 = arith.select %101, %98, %92 : vector<8x128xi1>, vector<8x128xf32>
    %103 = vector.shape_cast %102 : vector<8x128xf32> to vector<1x8x128xf32>
    %c0_60 = arith.constant 0 : index
    %c0_61 = arith.constant 0 : index
    %c0_62 = arith.constant 0 : index
    %104 = vector.load %arg15[%c0_60, %c0_61, %c0_62] : memref<1x8x128xf32, #tpu.memory_space<vmem>>, vector<1x8x128xf32>
    tpu.vector_store %arg15[%c0_60, %c0_61, %c0_62], %103 {strides = array<i32>} : memref<1x8x128xf32, #tpu.memory_space<vmem>>, vector<1x8x128xf32>,
    return
  }
  func.func @transform_0(%arg0: i32) -> (i32, i32, i32) {
    %c0_i32 = arith.constant 0 : i32
    %c0_i32_0 = arith.constant 0 : i32
    %c0_i32_1 = arith.constant 0 : i32
    return %arg0, %c0_i32, %c0_i32_0 : i32, i32, i32
  }
  func.func @transform_1(%arg0: i32) -> (i32, i32, i32) {
    %c0_i32 = arith.constant 0 : i32
    %c0_i32_0 = arith.constant 0 : i32
    %c0_i32_1 = arith.constant 0 : i32
    return %arg0, %c0_i32, %c0_i32_0 : i32, i32, i32
  }
  func.func @transform_2(%arg0: i32) -> (i32, i32, i32) {
    %c0_i32 = arith.constant 0 : i32
    %c0_i32_0 = arith.constant 0 : i32
    %c0_i32_1 = arith.constant 0 : i32
    %c0_i32_2 = arith.constant 0 : i32
    return %c0_i32, %c0_i32_0, %c0_i32_1 : i32, i32, i32
  }
  func.func @transform_3(%arg0: i32) -> (i32, i32) {
    %c0_i32 = arith.constant 0 : i32
    %c0_i32_0 = arith.constant 0 : i32
    %c0_i32_1 = arith.constant 0 : i32
    return %c0_i32, %c0_i32_0 : i32, i32
  }
  func.func @transform_4(%arg0: i32) -> (i32, i32) {
    %c0_i32 = arith.constant 0 : i32
    %c0_i32_0 = arith.constant 0 : i32
    %c0_i32_1 = arith.constant 0 : i32
    return %c0_i32, %c0_i32_0 : i32, i32
  }
  func.func @transform_5(%arg0: i32) -> (i32, i32) {
    %c0_i32 = arith.constant 0 : i32
    %c0_i32_0 = arith.constant 0 : i32
    %c0_i32_1 = arith.constant 0 : i32
    return %c0_i32, %c0_i32_0 : i32, i32
  }
  func.func @transform_6(%arg0: i32) -> (i32, i32) {
    %c0_i32 = arith.constant 0 : i32
    %c0_i32_0 = arith.constant 0 : i32
    %c0_i32_1 = arith.constant 0 : i32
    return %c0_i32, %c0_i32_0 : i32, i32
  }
  func.func @transform_7(%arg0: i32) -> (i32, i32) {
    %c0_i32 = arith.constant 0 : i32
    %c0_i32_0 = arith.constant 0 : i32
    %c0_i32_1 = arith.constant 0 : i32
    return %c0_i32, %c0_i32_0 : i32, i32
  }
  func.func @transform_8(%arg0: i32) -> (i32, i32) {
    %c0_i32 = arith.constant 0 : i32
    %c0_i32_0 = arith.constant 0 : i32
    %c0_i32_1 = arith.constant 0 : i32
    return %c0_i32, %c0_i32_0 : i32, i32
  }
  func.func @transform_9(%arg0: i32) -> (i32, i32) {
    %c0_i32 = arith.constant 0 : i32
    %c0_i32_0 = arith.constant 0 : i32
    %c0_i32_1 = arith.constant 0 : i32
    return %c0_i32, %c0_i32_0 : i32, i32
  }
  func.func @transform_10(%arg0: i32) -> (i32, i32) {
    %c0_i32 = arith.constant 0 : i32
    %c0_i32_0 = arith.constant 0 : i32
    %c0_i32_1 = arith.constant 0 : i32
    return %c0_i32, %c0_i32_0 : i32, i32
  }
  func.func @transform_11(%arg0: i32) -> (i32, i32) {
    %c0_i32 = arith.constant 0 : i32
    %c0_i32_0 = arith.constant 0 : i32
    %c0_i32_1 = arith.constant 0 : i32
    return %c0_i32, %c0_i32_0 : i32, i32
  }
  func.func @transform_12(%arg0: i32) -> (i32, i32) {
    %c0_i32 = arith.constant 0 : i32
    %c0_i32_0 = arith.constant 0 : i32
    %c0_i32_1 = arith.constant 0 : i32
    return %c0_i32, %c0_i32_0 : i32, i32
  }
  func.func @transform_13(%arg0: i32) -> (i32, i32, i32) {
    %c0_i32 = arith.constant 0 : i32
    %c0_i32_0 = arith.constant 0 : i32
    %c0_i32_1 = arith.constant 0 : i32
    return %arg0, %c0_i32, %c0_i32_0 : i32, i32, i32
  }
  func.func @transform_14(%arg0: i32) -> (i32, i32, i32) {
    %c0_i32 = arith.constant 0 : i32
    %c0_i32_0 = arith.constant 0 : i32
    %c0_i32_1 = arith.constant 0 : i32
    return %arg0, %c0_i32, %c0_i32_0 : i32, i32, i32
  }
  func.func @transform_15(%arg0: i32) -> (i32, i32, i32) {
    %c0_i32 = arith.constant 0 : i32
    %c0_i32_0 = arith.constant 0 : i32
    %c0_i32_1 = arith.constant 0 : i32
    return %arg0, %c0_i32, %c0_i32_0 : i32, i32, i32
  }
}

module attributes {stable_mosaic.version = 11 : i64} {
  func.func @_audio_kernel(%arg0: i32, %arg1: memref<1x16x4xi32, #tpu.memory_space<vmem>>, %arg2: memref<1x1x128xf32, #tpu.memory_space<vmem>>, %arg3: memref<4x128x128xbf16, #tpu.memory_space<vmem>>, %arg4: memref<3x128x128xbf16, #tpu.memory_space<vmem>>, %arg5: memref<1x128xf32, #tpu.memory_space<vmem>>, %arg6: memref<4x128x128xbf16, #tpu.memory_space<vmem>>, %arg7: memref<4x1x128xf32, #tpu.memory_space<vmem>>, %arg8: memref<1x4x16x128xf32, #tpu.memory_space<vmem>>) attributes {dimension_semantics = [#tpu.dimension_semantics<parallel>], iteration_bounds = array<i64: 2>, scalar_prefetch = 0 : i64, scratch_operands = 0 : i64, tpu.core_type = #tpu.core_type<tc>, window_params = [{transform_indices = @transform_0, window_bounds = array<i64: 1, 16, 4>}, {transform_indices = @transform_1, window_bounds = array<i64: 1, 1, 128>}, {pipeline_mode = #tpu.pipeline_mode<synchronous>, transform_indices = @transform_2, window_bounds = array<i64: 4, 128, 128>}, {pipeline_mode = #tpu.pipeline_mode<synchronous>, transform_indices = @transform_3, window_bounds = array<i64: 3, 128, 128>}, {pipeline_mode = #tpu.pipeline_mode<synchronous>, transform_indices = @transform_4, window_bounds = array<i64: 1, 128>}, {pipeline_mode = #tpu.pipeline_mode<synchronous>, transform_indices = @transform_5, window_bounds = array<i64: 4, 128, 128>}, {pipeline_mode = #tpu.pipeline_mode<synchronous>, transform_indices = @transform_6, window_bounds = array<i64: 4, 1, 128>}, {transform_indices = @transform_7, window_bounds = array<i64: 1, 4, 16, 128>}]} {
    %c0 = arith.constant 0 : index
    %c0_0 = arith.constant 0 : index
    %c0_1 = arith.constant 0 : index
    %0 = vector.load %arg1[%c0, %c0_0, %c0_1] : memref<1x16x4xi32, #tpu.memory_space<vmem>>, vector<1x16x4xi32>
    %1 = vector.shape_cast %0 : vector<1x16x4xi32> to vector<16x4xi32>
    %2 = tpu.iota {dimensions = array<i32: 1>} : vector<16x128xi32>
    %3 = vector.extract_strided_slice %1 {offsets = [0, 0], sizes = [16, 1], strides = [1, 1]} : vector<16x4xi32> to vector<16x1xi32>
    %4 = vector.broadcast %3 : vector<16x1xi32> to vector<16x128xi32>
    %5 = arith.cmpi eq, %2, %4 : vector<16x128xi32>
    %6 = arith.extui %5 : vector<16x128xi1> to vector<16x128xi32>
    %7 = arith.sitofp %6 : vector<16x128xi32> to vector<16x128xf32>
    %8 = arith.truncf %7 : vector<16x128xf32> to vector<16x128xbf16>
    %c0_2 = arith.constant 0 : index
    %c0_3 = arith.constant 0 : index
    %c0_4 = arith.constant 0 : index
    %9 = vector.load %arg3[%c0_2, %c0_3, %c0_4] : memref<4x128x128xbf16, #tpu.memory_space<vmem>>, vector<1x128x128xbf16>
    %10 = vector.shape_cast %9 : vector<1x128x128xbf16> to vector<128x128xbf16>
    %cst = arith.constant dense<0.000000e+00> : vector<16x128xf32>
    %11 = tpu.matmul %8, %10, %cst {dimension_numbers = #tpu.dot_dimension_numbers<[1], [0], [0], [1], [0, 0, 1, 1], [], []>} : vector<16x128xbf16>, vector<128x128xbf16>, vector<16x128xf32> -> vector<16x128xf32>
    %12 = vector.extract_strided_slice %1 {offsets = [0, 1], sizes = [16, 1], strides = [1, 1]} : vector<16x4xi32> to vector<16x1xi32>
    %13 = vector.broadcast %12 : vector<16x1xi32> to vector<16x128xi32>
    %14 = arith.cmpi eq, %2, %13 : vector<16x128xi32>
    %15 = arith.extui %14 : vector<16x128xi1> to vector<16x128xi32>
    %16 = arith.sitofp %15 : vector<16x128xi32> to vector<16x128xf32>
    %17 = arith.truncf %16 : vector<16x128xf32> to vector<16x128xbf16>
    %c1 = arith.constant 1 : index
    %c0_5 = arith.constant 0 : index
    %c0_6 = arith.constant 0 : index
    %18 = vector.load %arg3[%c1, %c0_5, %c0_6] : memref<4x128x128xbf16, #tpu.memory_space<vmem>>, vector<1x128x128xbf16>
    %19 = vector.shape_cast %18 : vector<1x128x128xbf16> to vector<128x128xbf16>
    %cst_7 = arith.constant dense<0.000000e+00> : vector<16x128xf32>
    %20 = tpu.matmul %17, %19, %cst_7 {dimension_numbers = #tpu.dot_dimension_numbers<[1], [0], [0], [1], [0, 0, 1, 1], [], []>} : vector<16x128xbf16>, vector<128x128xbf16>, vector<16x128xf32> -> vector<16x128xf32>
    %21 = arith.addf %11, %20 : vector<16x128xf32>
    %22 = vector.extract_strided_slice %1 {offsets = [0, 2], sizes = [16, 1], strides = [1, 1]} : vector<16x4xi32> to vector<16x1xi32>
    %23 = vector.broadcast %22 : vector<16x1xi32> to vector<16x128xi32>
    %24 = arith.cmpi eq, %2, %23 : vector<16x128xi32>
    %25 = arith.extui %24 : vector<16x128xi1> to vector<16x128xi32>
    %26 = arith.sitofp %25 : vector<16x128xi32> to vector<16x128xf32>
    %27 = arith.truncf %26 : vector<16x128xf32> to vector<16x128xbf16>
    %c2 = arith.constant 2 : index
    %c0_8 = arith.constant 0 : index
    %c0_9 = arith.constant 0 : index
    %28 = vector.load %arg3[%c2, %c0_8, %c0_9] : memref<4x128x128xbf16, #tpu.memory_space<vmem>>, vector<1x128x128xbf16>
    %29 = vector.shape_cast %28 : vector<1x128x128xbf16> to vector<128x128xbf16>
    %cst_10 = arith.constant dense<0.000000e+00> : vector<16x128xf32>
    %30 = tpu.matmul %27, %29, %cst_10 {dimension_numbers = #tpu.dot_dimension_numbers<[1], [0], [0], [1], [0, 0, 1, 1], [], []>} : vector<16x128xbf16>, vector<128x128xbf16>, vector<16x128xf32> -> vector<16x128xf32>
    %31 = arith.addf %21, %30 : vector<16x128xf32>
    %32 = vector.extract_strided_slice %1 {offsets = [0, 3], sizes = [16, 1], strides = [1, 1]} : vector<16x4xi32> to vector<16x1xi32>
    %33 = vector.broadcast %32 : vector<16x1xi32> to vector<16x128xi32>
    %34 = arith.cmpi eq, %2, %33 : vector<16x128xi32>
    %35 = arith.extui %34 : vector<16x128xi1> to vector<16x128xi32>
    %36 = arith.sitofp %35 : vector<16x128xi32> to vector<16x128xf32>
    %37 = arith.truncf %36 : vector<16x128xf32> to vector<16x128xbf16>
    %c3 = arith.constant 3 : index
    %c0_11 = arith.constant 0 : index
    %c0_12 = arith.constant 0 : index
    %38 = vector.load %arg3[%c3, %c0_11, %c0_12] : memref<4x128x128xbf16, #tpu.memory_space<vmem>>, vector<1x128x128xbf16>
    %39 = vector.shape_cast %38 : vector<1x128x128xbf16> to vector<128x128xbf16>
    %cst_13 = arith.constant dense<0.000000e+00> : vector<16x128xf32>
    %40 = tpu.matmul %37, %39, %cst_13 {dimension_numbers = #tpu.dot_dimension_numbers<[1], [0], [0], [1], [0, 0, 1, 1], [], []>} : vector<16x128xbf16>, vector<128x128xbf16>, vector<16x128xf32> -> vector<16x128xf32>
    %41 = arith.addf %31, %40 : vector<16x128xf32>
    %c0_14 = arith.constant 0 : index
    %c0_15 = arith.constant 0 : index
    %c0_16 = arith.constant 0 : index
    %42 = vector.load %arg2[%c0_14, %c0_15, %c0_16] : memref<1x1x128xf32, #tpu.memory_space<vmem>>, vector<1x1x128xf32>
    %43 = vector.shape_cast %42 : vector<1x1x128xf32> to vector<1x128xf32>
    %44 = vector.broadcast %43 : vector<1x128xf32> to vector<16x128xf32>
    %45 = arith.addf %41, %44 : vector<16x128xf32>
    %c0_17 = arith.constant 0 : index
    %c0_18 = arith.constant 0 : index
    %46 = vector.load %arg5[%c0_17, %c0_18] : memref<1x128xf32, #tpu.memory_space<vmem>>, vector<1x128xf32>
    %47 = tpu.iota {dimensions = array<i32: 0>} : vector<16x128xi32>
    %c1_i32 = arith.constant 1 : i32
    %48 = tpu.dynamic_rotate %45 by %c1_i32 dim 0 : vector<16x128xf32>, i32 -> vector<16x128xf32>
    %c1_i32_19 = arith.constant 1 : i32
    %49 = vector.broadcast %c1_i32_19 : i32 to vector<16x128xi32>
    %50 = arith.cmpi slt, %47, %49 : vector<16x128xi32>
    %cst_20 = arith.constant 0.000000e+00 : f32
    %51 = vector.broadcast %cst_20 : f32 to vector<16x128xf32>
    %52 = arith.select %50, %51, %48 : vector<16x128xi1>, vector<16x128xf32>
    %53 = arith.truncf %52 : vector<16x128xf32> to vector<16x128xbf16>
    %c0_21 = arith.constant 0 : index
    %c0_22 = arith.constant 0 : index
    %c0_23 = arith.constant 0 : index
    %54 = vector.load %arg4[%c0_21, %c0_22, %c0_23] : memref<3x128x128xbf16, #tpu.memory_space<vmem>>, vector<1x128x128xbf16>
    %55 = vector.shape_cast %54 : vector<1x128x128xbf16> to vector<128x128xbf16>
    %cst_24 = arith.constant dense<0.000000e+00> : vector<16x128xf32>
    %56 = tpu.matmul %53, %55, %cst_24 {dimension_numbers = #tpu.dot_dimension_numbers<[1], [0], [0], [1], [0, 0, 1, 1], [], []>} : vector<16x128xbf16>, vector<128x128xbf16>, vector<16x128xf32> -> vector<16x128xf32>
    %57 = vector.broadcast %46 : vector<1x128xf32> to vector<16x128xf32>
    %58 = arith.addf %57, %56 : vector<16x128xf32>
    %59 = arith.truncf %45 : vector<16x128xf32> to vector<16x128xbf16>
    %c1_25 = arith.constant 1 : index
    %c0_26 = arith.constant 0 : index
    %c0_27 = arith.constant 0 : index
    %60 = vector.load %arg4[%c1_25, %c0_26, %c0_27] : memref<3x128x128xbf16, #tpu.memory_space<vmem>>, vector<1x128x128xbf16>
    %61 = vector.shape_cast %60 : vector<1x128x128xbf16> to vector<128x128xbf16>
    %cst_28 = arith.constant dense<0.000000e+00> : vector<16x128xf32>
    %62 = tpu.matmul %59, %61, %cst_28 {dimension_numbers = #tpu.dot_dimension_numbers<[1], [0], [0], [1], [0, 0, 1, 1], [], []>} : vector<16x128xbf16>, vector<128x128xbf16>, vector<16x128xf32> -> vector<16x128xf32>
    %63 = arith.addf %58, %62 : vector<16x128xf32>
    %c15_i32 = arith.constant 15 : i32
    %64 = tpu.dynamic_rotate %45 by %c15_i32 dim 0 : vector<16x128xf32>, i32 -> vector<16x128xf32>
    %c15_i32_29 = arith.constant 15 : i32
    %65 = vector.broadcast %c15_i32_29 : i32 to vector<16x128xi32>
    %66 = arith.cmpi sge, %47, %65 : vector<16x128xi32>
    %cst_30 = arith.constant 0.000000e+00 : f32
    %67 = vector.broadcast %cst_30 : f32 to vector<16x128xf32>
    %68 = arith.select %66, %67, %64 : vector<16x128xi1>, vector<16x128xf32>
    %69 = arith.truncf %68 : vector<16x128xf32> to vector<16x128xbf16>
    %c2_31 = arith.constant 2 : index
    %c0_32 = arith.constant 0 : index
    %c0_33 = arith.constant 0 : index
    %70 = vector.load %arg4[%c2_31, %c0_32, %c0_33] : memref<3x128x128xbf16, #tpu.memory_space<vmem>>, vector<1x128x128xbf16>
    %71 = vector.shape_cast %70 : vector<1x128x128xbf16> to vector<128x128xbf16>
    %cst_34 = arith.constant dense<0.000000e+00> : vector<16x128xf32>
    %72 = tpu.matmul %69, %71, %cst_34 {dimension_numbers = #tpu.dot_dimension_numbers<[1], [0], [0], [1], [0, 0, 1, 1], [], []>} : vector<16x128xbf16>, vector<128x128xbf16>, vector<16x128xf32> -> vector<16x128xf32>
    %73 = arith.addf %63, %72 : vector<16x128xf32>
    %74 = arith.negf %73 : vector<16x128xf32>
    %75 = math.exp %74 : vector<16x128xf32>
    %cst_35 = arith.constant 1.000000e+00 : f32
    %76 = vector.broadcast %cst_35 : f32 to vector<16x128xf32>
    %77 = arith.addf %76, %75 : vector<16x128xf32>
    %78 = arith.divf %76, %77 : vector<16x128xf32>
    %79 = arith.mulf %73, %78 : vector<16x128xf32>
    %80 = arith.truncf %79 : vector<16x128xf32> to vector<16x128xbf16>
    %c0_36 = arith.constant 0 : index
    %c0_37 = arith.constant 0 : index
    %c0_38 = arith.constant 0 : index
    %81 = vector.load %arg6[%c0_36, %c0_37, %c0_38] : memref<4x128x128xbf16, #tpu.memory_space<vmem>>, vector<1x128x128xbf16>
    %82 = vector.shape_cast %81 : vector<1x128x128xbf16> to vector<128x128xbf16>
    %cst_39 = arith.constant dense<0.000000e+00> : vector<16x128xf32>
    %83 = tpu.matmul %80, %82, %cst_39 {dimension_numbers = #tpu.dot_dimension_numbers<[1], [0], [0], [1], [0, 0, 1, 1], [], []>} : vector<16x128xbf16>, vector<128x128xbf16>, vector<16x128xf32> -> vector<16x128xf32>
    %c0_40 = arith.constant 0 : index
    %c0_41 = arith.constant 0 : index
    %c0_42 = arith.constant 0 : index
    %84 = vector.load %arg7[%c0_40, %c0_41, %c0_42] : memref<4x1x128xf32, #tpu.memory_space<vmem>>, vector<1x1x128xf32>
    %85 = vector.shape_cast %84 : vector<1x1x128xf32> to vector<1x128xf32>
    %86 = vector.broadcast %85 : vector<1x128xf32> to vector<16x128xf32>
    %87 = arith.addf %83, %86 : vector<16x128xf32>
    %c0_43 = arith.constant 0 : index
    %c0_44 = arith.constant 0 : index
    %c0_45 = arith.constant 0 : index
    %c0_46 = arith.constant 0 : index
    %88 = vector.load %arg8[%c0_43, %c0_44, %c0_45, %c0_46] : memref<1x4x16x128xf32, #tpu.memory_space<vmem>>, vector<1x1x16x128xf32>
    %89 = vector.shape_cast %88 : vector<1x1x16x128xf32> to vector<16x128xf32>
    %90 = vector.shape_cast %87 : vector<16x128xf32> to vector<1x1x16x128xf32>
    tpu.vector_store %arg8[%c0_43, %c0_44, %c0_45, %c0_46], %90 {strides = array<i32>} : memref<1x4x16x128xf32, #tpu.memory_space<vmem>>, vector<1x1x16x128xf32>,
    %c1_47 = arith.constant 1 : index
    %c0_48 = arith.constant 0 : index
    %c0_49 = arith.constant 0 : index
    %91 = vector.load %arg6[%c1_47, %c0_48, %c0_49] : memref<4x128x128xbf16, #tpu.memory_space<vmem>>, vector<1x128x128xbf16>
    %92 = vector.shape_cast %91 : vector<1x128x128xbf16> to vector<128x128xbf16>
    %cst_50 = arith.constant dense<0.000000e+00> : vector<16x128xf32>
    %93 = tpu.matmul %80, %92, %cst_50 {dimension_numbers = #tpu.dot_dimension_numbers<[1], [0], [0], [1], [0, 0, 1, 1], [], []>} : vector<16x128xbf16>, vector<128x128xbf16>, vector<16x128xf32> -> vector<16x128xf32>
    %c1_51 = arith.constant 1 : index
    %c0_52 = arith.constant 0 : index
    %c0_53 = arith.constant 0 : index
    %94 = vector.load %arg7[%c1_51, %c0_52, %c0_53] : memref<4x1x128xf32, #tpu.memory_space<vmem>>, vector<1x1x128xf32>
    %95 = vector.shape_cast %94 : vector<1x1x128xf32> to vector<1x128xf32>
    %96 = vector.broadcast %95 : vector<1x128xf32> to vector<16x128xf32>
    %97 = arith.addf %93, %96 : vector<16x128xf32>
    %c0_54 = arith.constant 0 : index
    %c1_55 = arith.constant 1 : index
    %c0_56 = arith.constant 0 : index
    %c0_57 = arith.constant 0 : index
    %98 = vector.load %arg8[%c0_54, %c1_55, %c0_56, %c0_57] : memref<1x4x16x128xf32, #tpu.memory_space<vmem>>, vector<1x1x16x128xf32>
    %99 = vector.shape_cast %98 : vector<1x1x16x128xf32> to vector<16x128xf32>
    %100 = vector.shape_cast %97 : vector<16x128xf32> to vector<1x1x16x128xf32>
    tpu.vector_store %arg8[%c0_54, %c1_55, %c0_56, %c0_57], %100 {strides = array<i32>} : memref<1x4x16x128xf32, #tpu.memory_space<vmem>>, vector<1x1x16x128xf32>,
    %c2_58 = arith.constant 2 : index
    %c0_59 = arith.constant 0 : index
    %c0_60 = arith.constant 0 : index
    %101 = vector.load %arg6[%c2_58, %c0_59, %c0_60] : memref<4x128x128xbf16, #tpu.memory_space<vmem>>, vector<1x128x128xbf16>
    %102 = vector.shape_cast %101 : vector<1x128x128xbf16> to vector<128x128xbf16>
    %cst_61 = arith.constant dense<0.000000e+00> : vector<16x128xf32>
    %103 = tpu.matmul %80, %102, %cst_61 {dimension_numbers = #tpu.dot_dimension_numbers<[1], [0], [0], [1], [0, 0, 1, 1], [], []>} : vector<16x128xbf16>, vector<128x128xbf16>, vector<16x128xf32> -> vector<16x128xf32>
    %c2_62 = arith.constant 2 : index
    %c0_63 = arith.constant 0 : index
    %c0_64 = arith.constant 0 : index
    %104 = vector.load %arg7[%c2_62, %c0_63, %c0_64] : memref<4x1x128xf32, #tpu.memory_space<vmem>>, vector<1x1x128xf32>
    %105 = vector.shape_cast %104 : vector<1x1x128xf32> to vector<1x128xf32>
    %106 = vector.broadcast %105 : vector<1x128xf32> to vector<16x128xf32>
    %107 = arith.addf %103, %106 : vector<16x128xf32>
    %c0_65 = arith.constant 0 : index
    %c2_66 = arith.constant 2 : index
    %c0_67 = arith.constant 0 : index
    %c0_68 = arith.constant 0 : index
    %108 = vector.load %arg8[%c0_65, %c2_66, %c0_67, %c0_68] : memref<1x4x16x128xf32, #tpu.memory_space<vmem>>, vector<1x1x16x128xf32>
    %109 = vector.shape_cast %108 : vector<1x1x16x128xf32> to vector<16x128xf32>
    %110 = vector.shape_cast %107 : vector<16x128xf32> to vector<1x1x16x128xf32>
    tpu.vector_store %arg8[%c0_65, %c2_66, %c0_67, %c0_68], %110 {strides = array<i32>} : memref<1x4x16x128xf32, #tpu.memory_space<vmem>>, vector<1x1x16x128xf32>,
    %c3_69 = arith.constant 3 : index
    %c0_70 = arith.constant 0 : index
    %c0_71 = arith.constant 0 : index
    %111 = vector.load %arg6[%c3_69, %c0_70, %c0_71] : memref<4x128x128xbf16, #tpu.memory_space<vmem>>, vector<1x128x128xbf16>
    %112 = vector.shape_cast %111 : vector<1x128x128xbf16> to vector<128x128xbf16>
    %cst_72 = arith.constant dense<0.000000e+00> : vector<16x128xf32>
    %113 = tpu.matmul %80, %112, %cst_72 {dimension_numbers = #tpu.dot_dimension_numbers<[1], [0], [0], [1], [0, 0, 1, 1], [], []>} : vector<16x128xbf16>, vector<128x128xbf16>, vector<16x128xf32> -> vector<16x128xf32>
    %c3_73 = arith.constant 3 : index
    %c0_74 = arith.constant 0 : index
    %c0_75 = arith.constant 0 : index
    %114 = vector.load %arg7[%c3_73, %c0_74, %c0_75] : memref<4x1x128xf32, #tpu.memory_space<vmem>>, vector<1x1x128xf32>
    %115 = vector.shape_cast %114 : vector<1x1x128xf32> to vector<1x128xf32>
    %116 = vector.broadcast %115 : vector<1x128xf32> to vector<16x128xf32>
    %117 = arith.addf %113, %116 : vector<16x128xf32>
    %c0_76 = arith.constant 0 : index
    %c3_77 = arith.constant 3 : index
    %c0_78 = arith.constant 0 : index
    %c0_79 = arith.constant 0 : index
    %118 = vector.load %arg8[%c0_76, %c3_77, %c0_78, %c0_79] : memref<1x4x16x128xf32, #tpu.memory_space<vmem>>, vector<1x1x16x128xf32>
    %119 = vector.shape_cast %118 : vector<1x1x16x128xf32> to vector<16x128xf32>
    %120 = vector.shape_cast %117 : vector<16x128xf32> to vector<1x1x16x128xf32>
    tpu.vector_store %arg8[%c0_76, %c3_77, %c0_78, %c0_79], %120 {strides = array<i32>} : memref<1x4x16x128xf32, #tpu.memory_space<vmem>>, vector<1x1x16x128xf32>,
    return
  }
  func.func @transform_0(%arg0: i32) -> (i32, i32, i32) {
    %c0_i32 = arith.constant 0 : i32
    %c0_i32_0 = arith.constant 0 : i32
    %c0_i32_1 = arith.constant 0 : i32
    return %arg0, %c0_i32, %c0_i32_0 : i32, i32, i32
  }
  func.func @transform_1(%arg0: i32) -> (i32, i32, i32) {
    %c0_i32 = arith.constant 0 : i32
    %c0_i32_0 = arith.constant 0 : i32
    %c0_i32_1 = arith.constant 0 : i32
    return %arg0, %c0_i32, %c0_i32_0 : i32, i32, i32
  }
  func.func @transform_2(%arg0: i32) -> (i32, i32, i32) {
    %c0_i32 = arith.constant 0 : i32
    %c0_i32_0 = arith.constant 0 : i32
    %c0_i32_1 = arith.constant 0 : i32
    %c0_i32_2 = arith.constant 0 : i32
    return %c0_i32, %c0_i32_0, %c0_i32_1 : i32, i32, i32
  }
  func.func @transform_3(%arg0: i32) -> (i32, i32, i32) {
    %c0_i32 = arith.constant 0 : i32
    %c0_i32_0 = arith.constant 0 : i32
    %c0_i32_1 = arith.constant 0 : i32
    %c0_i32_2 = arith.constant 0 : i32
    return %c0_i32, %c0_i32_0, %c0_i32_1 : i32, i32, i32
  }
  func.func @transform_4(%arg0: i32) -> (i32, i32) {
    %c0_i32 = arith.constant 0 : i32
    %c0_i32_0 = arith.constant 0 : i32
    %c0_i32_1 = arith.constant 0 : i32
    return %c0_i32, %c0_i32_0 : i32, i32
  }
  func.func @transform_5(%arg0: i32) -> (i32, i32, i32) {
    %c0_i32 = arith.constant 0 : i32
    %c0_i32_0 = arith.constant 0 : i32
    %c0_i32_1 = arith.constant 0 : i32
    %c0_i32_2 = arith.constant 0 : i32
    return %c0_i32, %c0_i32_0, %c0_i32_1 : i32, i32, i32
  }
  func.func @transform_6(%arg0: i32) -> (i32, i32, i32) {
    %c0_i32 = arith.constant 0 : i32
    %c0_i32_0 = arith.constant 0 : i32
    %c0_i32_1 = arith.constant 0 : i32
    %c0_i32_2 = arith.constant 0 : i32
    return %c0_i32, %c0_i32_0, %c0_i32_1 : i32, i32, i32
  }
  func.func @transform_7(%arg0: i32) -> (i32, i32, i32, i32) {
    %c0_i32 = arith.constant 0 : i32
    %c0_i32_0 = arith.constant 0 : i32
    %c0_i32_1 = arith.constant 0 : i32
    %c0_i32_2 = arith.constant 0 : i32
    return %arg0, %c0_i32, %c0_i32_0, %c0_i32_1 : i32, i32, i32, i32
  }
}

</mosaic_0001>

<bundles_post_ra>
// kernel: clean_tts_forward.2
= control target key start
LH: loop header
LB: loop body
LE: loop exit
PB: predicated region body
PF: predicated region fallthrough
CT: control target
= control target key end

     0   :  { %s2350_s0 = inlined_call_operand.vmem [shape: bf16[2,8,128], index: 0, kind: input, shape index: {}]   ;;  %s2351_s1 = inlined_call_operand.vmem [shape: f32[2,1,128], index: 1, kind: input, shape index: {}]   ;;  %s2352_s2 = inlined_call_operand.hbm [shape: bf16[3,128,128], index: 2, kind: input, shape index: {}]   ;;  %s2353_s3 = inlined_call_operand.vmem [shape: f32[1,128], index: 3, kind: input, shape index: {}]   ;;  %s2354_s4 = inlined_call_operand.vmem [shape: bf16[128,128], index: 4, kind: input, shape index: {}]   ;;  %s2355_s5 = inlined_call_operand.vmem [shape: f32[1,128], index: 5, kind: input, shape index: {}]   ;;  %s2356_s6 = inlined_call_operand.hbm [shape: bf16[128,128], index: 6, kind: input, shape index: {}]   ;;  %s2357_s7 = inlined_call_operand.hbm [shape: bf16[128,128], index: 7, kind: input, shape index: {}]   ;;  %s2358_s8 = inlined_call_operand.vmem [shape: f32[1,128], index: 8, kind: input, shape index: {}]   ;;  %s2359_s9 = inlined_call_operand.hbm [shape: bf16[128,128], index: 9, kind: input, shape index: {}]   ;;  %s2360_s10 = inlined_call_operand.vmem [shape: f32[1,128], index: 10, kind: input, shape index: {}]   ;;  %s2361_s11 = inlined_call_operand.hbm [shape: bf16[128,128], index: 11, kind: input, shape index: {}]   ;;  %s2362_s12 = inlined_call_operand.vmem [shape: f32[1,128], index: 12, kind: input, shape index: {}]   ;;  %s2363_s13 = inlined_call_operand.vmem [shape: f32[2,8,128], index: 13, kind: output, shape index: {0}]   ;;  %s2364_s14 = inlined_call_operand.vmem [shape: f32[2,8,128], index: 14, kind: output, shape index: {1}]   ;;  %s2365_s15 = inlined_call_operand.vmem [shape: f32[2,1,128], index: 15, kind: output, shape index: {2}]  }
   0x1   :  { %2367 = sst [smem:[#allocation14_spill]] %s2352_s2 }
   0x2   :  { %2368 = sst [smem:[#allocation15_spill]] %s2356_s6 }
   0x3   :  { %2369 = sst [smem:[#allocation16_spill]] %s2359_s9 }
   0x4   :  { %2370 = sst [smem:[#allocation17_spill]] %s2364_s14 }
   0x5   :  { %21 = vsyncpa [#allocation3], 0 }
   0x6   :  { %22 = vsyncpa [#allocation5], 0 }
   0x7   :  { %23 = vsyncpa [#allocation8], 0  ;;  %s2213_s18 = smov 0  }
   0x8 LB: > { %2371 = sst [smem:[#allocation13_spill]] %s2123_s18  ;;  %s2219_s19 = sadd.s32 4294967295, %s2123_s18   ;;  %s2123_s18 = sphi %s2213_s18, %s29_s18  }
   0x9   : > { %p1521_p0 = scmp.ge.s32.totalorder %s2123_s18, 1  ;;  %p395_p1 = scmp.lt.s32.totalorder %s2123_s18, 3 }
   0xa   : > { %p1909_p2 = scmp.eq.s32.totalorder %s2219_s19, 0  ;;  %s2372_s6 = sld [smem:[#allocation15_spill]] }
   0xb   : > { %p2227_p3 = pnand %p1521_p0, %p395_p1  ;;  %s2374_s9 = sld [smem:[#allocation16_spill]] }
   0xc   : > { %s2125_s27 = smov [#allocation4]   ;;  %s2126_s30 = smov [#allocation7]  }
   0xd   : > { %p1893_p4 = pneg %p2227_p3  ;;  %s431_s28 = sshll.u32 %s2125_s27, 4  ;;  %s432_s28 = int_to_ptr.vmem [resolvable:$true] %s431_s28 }
   0xe   : > { %s462_s16 = sshll.u32 %s2126_s30, 4  ;;  %s2376_s2 = sld [smem:[#allocation14_spill]]  ;;  %s463_s16 = int_to_ptr.vmem [resolvable:$true] %s462_s16 }
   0xf   : > { %p2238_p5 = pnand %p1909_p2, %p1893_p4  ;;  %s2127_s24 = smov 64  }
  0x10   : > { %s429_s22 = sshll.u32 %s2372_s6, 4  ;;  %s2128_s25 = smov 4   ;;  %s430_s22 = int_to_ptr.hbm [resolvable:$true] %s429_s22 }
  0x11   : > { %s460_s26 = sshll.u32 %s2374_s9, 4  ;;  %s2129_s27 = smov [#allocation2]   ;;  %s461_s26 = int_to_ptr.hbm [resolvable:$true] %s460_s26 }
  0x12   : > { %1899 = dma.hbm_to_vmem [thread:$0]  (!%p2238_p5), %s430_s22, 1024, %s432_s28, [#allocation5], %s2127_s24, %s2127_s24, %s2128_s25  }
  0x13   : > { %1905 = dma.hbm_to_vmem [thread:$0]  (!%p2238_p5), %s461_s26, 1024, %s463_s16, [#allocation8], %s2127_s24, %s2127_s24, %s2128_s25  }
  0x14   : > { %s406_s21 = sshll.u32 %s2376_s2, 4  ;;  %s408_s6 = sshll.u32 %s2129_s27, 4  ;;  %s407_s21 = int_to_ptr.hbm [resolvable:$true] %s406_s21  ;;  %s409_s6 = int_to_ptr.vmem [resolvable:$true] %s408_s6 }
  0x15   : > { %s443_s30 = sshll.u32 %s2357_s7, 4  ;;  %s477_s2 = sshll.u32 %s2361_s11, 4  ;;  %s444_s30 = int_to_ptr.hbm [resolvable:$true] %s443_s30  ;;  %s478_s2 = int_to_ptr.hbm [resolvable:$true] %s477_s2 }
  0x16   : > { %1896 = dma.hbm_to_vmem [thread:$0]  (!%p2238_p5), %s407_s21, 3072, %s409_s6, [#allocation3], %s2127_s24, %s2127_s24, %s2128_s25  }
  0x17   : > { %s2130_s14 = smov [#allocation6]   ;;  %s2131_s26 = smov [#allocation9]  }
  0x18   : > { %s445_s22 = sshll.u32 %s2130_s14, 4  ;;  %s479_s28 = sshll.u32 %s2131_s26, 4  ;;  %s446_s22 = int_to_ptr.vmem [resolvable:$true] %s445_s22  ;;  %s480_s28 = int_to_ptr.vmem [resolvable:$true] %s479_s28 }
  0x19   : > { %1902 = dma.hbm_to_vmem [thread:$0]  (!%p2238_p5), %s444_s30, 1024, %s446_s22, [#allocation5], %s2127_s24, %s2127_s24, %s2128_s25  }
  0x1a   : > { %1908 = dma.hbm_to_vmem [thread:$0]  (!%p2238_p5), %s478_s2, 1024, %s480_s28, [#allocation8], %s2127_s24, %s2127_s24, %s2128_s25  }
  0x1b   : > { %511 = sbr.rel (%p2227_p3) target bundleno = 549 (0x225), region = 72 }
  0x20   : > { %2110 = dma.done.wait (%p1909_p2), [#allocation3], 3072  }
  0x21   : > { %2112 = vsyncadd (%p1909_p2), [#allocation3], 4294964224 }
  0x22   : > { %2114 = dma.done.wait (%p1909_p2), [#allocation5], 2048  }
  0x23   : > { %2116 = vsyncadd (%p1909_p2), [#allocation5], 4294965248 }
  0x24   : > { %2118 = dma.done.wait (%p1909_p2), [#allocation8], 2048  }
  0x25   : > { %2120 = vsyncadd (%p1909_p2), [#allocation8], 4294965248  ;;  %v1814_v0 = vld [vmem:[#allocation2 + $0x38] sm:$0xff]  ;;  %v1813_v4 = vld [vmem:[#allocation2 + $0x30] sm:$0xff]  ;;  %p588_p6 = scmp.lt.s32.totalorder %s2219_s19, 1  ;;  %v609_v25 = vlaneseq }
  0x26   : > { %v1822_v1 = vld [vmem:[#allocation2 + $0x78] sm:$0xff]  ;;  %679 = vmatpush.bf16.msra.mxu0 %v1814_v0  ;;  %v1821_v5 = vld [vmem:[#allocation2 + $0x70] sm:$0xff]  ;;  %v1812_v8 = vld [vmem:[#allocation2 + $0x28] sm:$0xff] }
  0x27   : > { %v1830_v2 = vld [vmem:[#allocation2 + $0xb8] sm:$0xff]  ;;  %761 = vmatpush.bf16.msra.mxu1 %v1822_v1  ;;  %v1829_v6 = vld [vmem:[#allocation2 + $0xb0] sm:$0xff]  ;;  %v1820_v9 = vld [vmem:[#allocation2 + $0x68] sm:$0xff]  ;;  %s2380_s19 = smov (!%p588_p6, %s2219_s19), 1  ;;  %v610_v31 = vshrl.u32 %v609_v25, 7 }
  0x28   : > { %v1838_v3 = vld [vmem:[%s2354_s4 + $0x38] sm:$0xff]  ;;  %844 = vmatpush.bf16.msra.mxu2 %v1830_v2  ;;  %v1837_v7 = vld [vmem:[%s2354_s4 + $0x30] sm:$0xff]  ;;  %v1828_v10 = vld [vmem:[#allocation2 + $0xa8] sm:$0xff]  ;;  %s1534_s21 = sshll.u32 %s2380_s19, 2  ;;  %s594_s29 = scalar_lea.vmem %s2351_s1, %s2380_s19 }
  0x29   : > { %946 = vmatpush.bf16.msra.mxu3 %v1838_v3  ;;  %v1836_v11 = vld [vmem:[%s2354_s4 + $0x28] sm:$0xff]  ;;  %v1811_v12 = vld [vmem:[#allocation2 + $0x20] sm:$0xff]  ;;  %v1810_v16 = vld [vmem:[#allocation2 + $0x18] sm:$0xff]  ;;  %s591_s17 = scalar_lea.vmem %s2350_s0, %s1534_s21  ;;  %vm1871_vm0 = vcmp.ge.s32.totalorder %v610_v31, 1  ;;  %vm1872_vm1 = vcmp.lt.s32.totalorder %v610_v31, 7  ;;  %s1535_s24 = sshll.u32 %s2380_s19, 3 }
  0x2a   : > { %680 = vmatpush.bf16.msra.mxu0 %v1813_v4  ;;  %v1819_v13 = vld [vmem:[#allocation2 + $0x60] sm:$0xff]  ;;  %v1818_v17 = vld [vmem:[#allocation2 + $0x58] sm:$0xff]  ;;  %v1809_v20 = vld [vmem:[#allocation2 + $0x10] sm:$0xff]  ;;  %s598_s30 = scalar_lea.vmem %s2363_s13, %s1535_s24  ;;  %s605_s6 = scalar_lea.vmem %s2365_s15, %s2380_s19 }
  0x2b   : > { %762 = vmatpush.bf16.msra.mxu1 %v1821_v5  ;;  %v1827_v14 = vld [vmem:[#allocation2 + $0xa0] sm:$0xff]  ;;  %v1826_v18 = vld [vmem:[#allocation2 + $0x98] sm:$0xff]  ;;  %v1817_v21 = vld [vmem:[#allocation2 + $0x50] sm:$0xff] }
  0x2c   : > { %845 = vmatpush.bf16.msra.mxu2 %v1829_v6  ;;  %v1835_v15 = vld [vmem:[%s2354_s4 + $0x20] sm:$0xff]  ;;  %v1834_v19 = vld [vmem:[%s2354_s4 + $0x18] sm:$0xff]  ;;  %v1825_v23 = vld [vmem:[#allocation2 + $0x90] sm:$0xff] }
  0x2d   : > { %947 = vmatpush.bf16.msra.mxu3 %v1837_v7  ;;  %v606_v22 = vld [vmem:[%s591_s17] sm:$0xf]  ;;  %v1833_v24 = vld [vmem:[%s2354_s4 + $0x10] sm:$0xff]  ;;  %v1808_v27 = vld [vmem:[#allocation2 + $0x8] sm:$0xff] }
  0x2e   : > { %681 = vmatpush.bf16.msra.mxu0 %v1812_v8  ;;  %v607_v26 = vunpack.c.l.bf16 %v606_v22  ;;  %v1816_v28 = vld [vmem:[#allocation2 + $0x48] sm:$0xff]  ;;  %v1807_v33 = vld [vmem:[#allocation2] sm:$0xff]  ;;  %vm1571_vm2 = vmpackc.low %vm1871_vm0, %vm1871_vm0 }
  0x2f   : > { %763 = vmatpush.bf16.msra.mxu1 %v1820_v9  ;;  %v1824_v29 = vld [vmem:[#allocation2 + $0x88] sm:$0xff]  ;;  %v1815_v34 = vld [vmem:[#allocation2 + $0x40] sm:$0xff]  ;;  %vm1640_vm3 = vmpackc.low %vm1872_vm1, %vm1872_vm1 }
  0x30   : > { %846 = vmatpush.bf16.msra.mxu2 %v1828_v10  ;;  %v1832_v30 = vld [vmem:[%s2354_s4 + $0x8] sm:$0xff]  ;;  %v611_v32 = vrot.slane %v607_v26, 7  ;;  %v775_v35 = vrot.slane %v607_v26, 1  ;;  %v1823_v36 = vld [vmem:[#allocation2 + $0x80] sm:$0xff]  ;;  %v1862_v40 = vld [vmem:[#allocation6 + $0x38] sm:$0xff] }
  0x31   : > { %948 = vmatpush.bf16.msra.mxu3 %v1836_v11  ;;  %v1831_v37 = vld [vmem:[%s2354_s4] sm:$0xff]  ;;  %v1861_v41 = vld [vmem:[#allocation6 + $0x30] sm:$0xff]  ;;  %v1854_v42 = vld [vmem:[#allocation4 + $0x38] sm:$0xff] }
  0x32   : > { %682 = vmatpush.bf16.msra.mxu0 %v1811_v12  ;;  %v1572_v38 = vpack.c.bf16 %v611_v32, %v611_v32  ;;  %v1641_v39 = vpack.c.bf16 %v775_v35, %v775_v35  ;;  %v1860_v43 = vld [vmem:[#allocation6 + $0x28] sm:$0xff]  ;;  %v1853_v44 = vld [vmem:[#allocation4 + $0x30] sm:$0xff]  ;;  %v1859_v45 = vld [vmem:[#allocation6 + $0x20] sm:$0xff] }
  0x33   : > { %764 = vmatpush.bf16.msra.mxu1 %v1819_v13  ;;  %v1852_v46 = vld [vmem:[#allocation4 + $0x28] sm:$0xff]  ;;  %v1858_v47 = vld [vmem:[#allocation6 + $0x18] sm:$0xff]  ;;  %v1851_v48 = vld [vmem:[#allocation4 + $0x20] sm:$0xff] }
  0x34   : > { %847 = vmatpush.bf16.msra.mxu2 %v1827_v14  ;;  %v1846_v49 = vld [vmem:[#allocation9 + $0x38] sm:$0xff]  ;;  %v1857_v50 = vld [vmem:[#allocation6 + $0x10] sm:$0xff]  ;;  %v1935_v52 = vld [vmem:[%s2353_s3] ss:$0 sm:$0xff] }
  0x35   : > { %949 = vmatpush.bf16.msra.mxu3 %v1835_v15  ;;  %v1850_v51 = vld [vmem:[#allocation4 + $0x18] sm:$0xff]  ;;  %v1845_v53 = vld [vmem:[#allocation9 + $0x30] sm:$0xff]  ;;  %v1856_v56 = vld [vmem:[#allocation6 + $0x8] sm:$0xff] }
  0x36   : > { %683 = vmatpush.bf16.msra.mxu0 %v1810_v16  ;;  %v1849_v57 = vld [vmem:[#allocation4 + $0x10] sm:$0xff]  ;;  %v1844_v59 = vld [vmem:[#allocation9 + $0x28] sm:$0xff]  ;;  %v1936_v61 = vld [vmem:[%s2355_s5] ss:$0 sm:$0xff] }
  0x37   : > { %765 = vmatpush.bf16.msra.mxu1 %v1818_v17  ;;  %v1855_v62 = vld [vmem:[#allocation6] sm:$0xff]  ;;  %v1848_v63 = vld [vmem:[#allocation4 + $0x8] sm:$0xff]  ;;  %v1842_v10 = vld [vmem:[#allocation9 + $0x18] sm:$0xff] }
  0x38   : > { %848 = vmatpush.bf16.msra.mxu2 %v1826_v18  ;;  %v1843_v0 = vld [vmem:[#allocation9 + $0x20] sm:$0xff]  ;;  %v1841_v13 = vld [vmem:[#allocation9 + $0x10] sm:$0xff]  ;;  %v1840_v16 = vld [vmem:[#allocation9 + $0x8] sm:$0xff] }
  0x39   : > { %950 = vmatpush.bf16.msra.mxu3 %v1834_v19  ;;  %v1075_v1 = vld [vmem:[%s594_s29] sm:$0x1]  ;;  %s2377_s29 = sld [smem:[#allocation17_spill]] }
  0x3a   : > { %684 = vmatpush.bf16.msra.mxu0 %v1809_v20  ;;  %v1847_v2 = vld [vmem:[#allocation4] sm:$0xff]  ;;  %v1076_v5 = vpack.c.bf16 %v1075_v1, %v1075_v1  ;;  %v1866_v1 = vld [vmem:[#allocation7 + $0x18] sm:$0xff] }
  0x3b   : > { %766 = vmatpush.bf16.msra.mxu1 %v1817_v21  ;;  %v1839_v21 = vld [vmem:[#allocation9] sm:$0xff] }
  0x3c   : > { %849 = vmatpush.bf16.msra.mxu2 %v1825_v23  ;;  %v1870_v23 = vld [vmem:[#allocation7 + $0x38] sm:$0xff] }
  0x3d   : > { %951 = vmatpush.bf16.msra.mxu3 %v1833_v24 }
  0x3e   : > { %685 = vmatpush.bf16.msra.mxu0 %v1808_v27 }
  0x3f   : > { %767 = vmatpush.bf16.msra.mxu1 %v1816_v28  ;;  %v1869_v28 = vld [vmem:[#allocation7 + $0x30] sm:$0xff]  ;;  %s602_s16 = scalar_lea.vmem %s2377_s29, %s1535_s24 }
  0x40   : > { %850 = vmatpush.bf16.msra.mxu2 %v1824_v29 }
  0x41   : > { %952 = vmatpush.bf16.msra.mxu3 %v1832_v30 }
  0x42   : > { %686 = vmatpush.bf16.msra.mxu0 %v1807_v33 }
  0x43   : > { %768 = vmatpush.bf16.msra.mxu1 %v1815_v34 }
  0x44   : > { %851 = vmatpush.bf16.msra.mxu2 %v1823_v36  ;;  %v1868_v36 = vld [vmem:[#allocation7 + $0x28] sm:$0xff] }
  0x45   : > { %953 = vmatpush.bf16.msra.mxu3 %v1831_v37  ;;  %1573 = vmatmul.msk.bf16.vlgmr.msra.gmra.mxu0 %vm1571_vm2, %v1572_v38 }
  0x46   : > { %769 = vmatmul.bf16.vlgmr.msra.gmra.mxu1 %v606_v22  ;;  %1060 = vmatpush.bf16.msrb.mxu0 %v1846_v49 }
  0x47   : > { %1642 = vmatmul.msk.bf16.vlgmr.msra.gmra.mxu2 %vm1640_vm3, %v1641_v39  ;;  %1157 = vmatpush.bf16.msrb.mxu1 %v1862_v40 }
  0x48   : > { %954 = vmatmul.bf16.vlgmr.msra.gmra.mxu3 %v606_v22  ;;  %1219 = vmatpush.bf16.msrb.mxu2 %v1854_v42  ;;  %v2132_v22 = vmov 8.0  }
  0x49   : > { %1307 = vmatpush.bf16.msrb.mxu3 %v1870_v23 }
  0x4a   : > { %1061 = vmatpush.bf16.msrb.mxu0 %v1845_v53 }
  0x4b   : > { %1158 = vmatpush.bf16.msrb.mxu1 %v1861_v41 }
  0x4c   : > { %1220 = vmatpush.bf16.msrb.mxu2 %v1853_v44 }
  0x4d   : > { %1308 = vmatpush.bf16.msrb.mxu3 %v1869_v28 }
  0x4e   : > { %1062 = vmatpush.bf16.msrb.mxu0 %v1844_v59 }
  0x4f   : > { %1159 = vmatpush.bf16.msrb.mxu1 %v1860_v43 }
  0x50   : > { %1221 = vmatpush.bf16.msrb.mxu2 %v1852_v46 }
  0x51   : > { %1309 = vmatpush.bf16.msrb.mxu3 %v1868_v36  ;;  %v1347_v36 = vand.u32 127, %v609_v25 }
  0x52   : > { %1063 = vmatpush.bf16.msrb.mxu0 %v1843_v0  ;;  %v1867_v0 = vld [vmem:[#allocation7 + $0x20] sm:$0xff] }
  0x53   : > { %1160 = vmatpush.bf16.msrb.mxu1 %v1859_v45  ;;  %vm1348_vm2 = vcmp.eq.s32.totalorder %v1347_v36, 0 }
  0x54   : > { %1222 = vmatpush.bf16.msrb.mxu2 %v1851_v48 }
  0x55   : > { %1310 = vmatpush.bf16.msrb.mxu3 %v1867_v0 }
  0x56   : > { %1064 = vmatpush.bf16.msrb.mxu0 %v1842_v10 }
  0x57   : > { %1161 = vmatpush.bf16.msrb.mxu1 %v1858_v47 }
  0x58   : > { %1223 = vmatpush.bf16.msrb.mxu2 %v1850_v51 }
  0x59   : > { %1311 = vmatpush.bf16.msrb.mxu3 %v1866_v1 }
  0x5a   : > { %1065 = vmatpush.bf16.msrb.mxu0 %v1841_v13  ;;  %v1011_v13 = vld [vmem:[%s2362_s12] sm:$0x1] }
  0x5b   : > { %1162 = vmatpush.bf16.msrb.mxu1 %v1857_v50 }
  0x5c   : > { %1224 = vmatpush.bf16.msrb.mxu2 %v1849_v57 }
  0x5e   : > { %1066 = vmatpush.bf16.msrb.mxu0 %v1840_v16 }
  0x5f   : > { %1163 = vmatpush.bf16.msrb.mxu1 %v1856_v56 }
  0x60   : > { %1225 = vmatpush.bf16.msrb.mxu2 %v1848_v63 }
  0x62   : > { %1067 = vmatpush.bf16.msrb.mxu0 %v1839_v21 }
  0x63   : > { %1164 = vmatpush.bf16.msrb.mxu1 %v1855_v62 }
  0x64   : > { %1226 = vmatpush.bf16.msrb.mxu2 %v1847_v2  ;;  %v1865_v2 = vld [vmem:[#allocation7 + $0x10] sm:$0xff] }
  0x65   : > { %1312 = vmatpush.bf16.msrb.mxu3 %v1865_v2 }
  0x66   : > { %1165 = vmatmul.bf16.vlgmr.msrb.gmra.mxu1 %v1076_v5  ;;  %v1864_v5 = vld [vmem:[#allocation7 + $0x8] sm:$0xff] }
  0x69   : > { %1313 = vmatpush.bf16.msrb.mxu3 %v1864_v5 }
  0xc2   : > { %v688_v54 = vpop.f32.mrf.mxu0 }
  0xc3   : > { %v770_v55 = vpop.f32.mrf.mxu1  ;;  %v695_v58 = vadd.f32 %v1935_v52, %v688_v54 }
  0xc5   : > { %v774_v60 = vadd.f32 %v770_v55, %v695_v58 }
  0xca   : > { %v853_v3 = vpop.f32.mrf.mxu2  ;;  %v690_v8 = vpop.f32.mrf.mxu0 }
  0xcb   : > { %v955_v4 = vpop.f32.mrf.mxu3  ;;  %v2318_v6 = vadd.f32 %v853_v3, %v774_v60  ;;  %v772_v9 = vpop.f32.mrf.mxu1  ;;  %v1937_v8 = vld [vmem:[%s2358_s8] ss:$0 sm:$0xff] }
  0xcc   : > { %v956_v7 = vadd.f32 %v1936_v61, %v955_v4 }
  0xcd   : > { %v1643_v11 = vmul.f32 -1.442695, %v2318_v6 }
  0xce   : > { %v1676_v12 = vmul.f32 -1.442695, %v956_v7 }
  0xcf   : > { %1939 = vpow2.f32 %v1643_v11 }
  0xd0   : > { %1941 = vpow2.f32 %v1676_v12 }
  0xd2   : > { %v855_v14 = vpop.f32.mrf.mxu2 }
  0xd3   : > { %v957_v15 = vpop.f32.mrf.mxu3 }
  0xd5   : > { %v1940_v17 = vpop.eup %1939 }
  0xd6   : > { %v1942_v18 = vpop.eup %1941  ;;  %v861_v19 = vadd.f32 1.0, %v1940_v17 }
  0xd7   : > { %v962_v20 = vadd.f32 1.0, %v1942_v18 }
  0xd8   : > { %1943 = vrcp.f32 %v861_v19  ;;  %v873_v31 = vand.u32 2147483648, %v861_v19  ;;  %v871_v35 = vand.u32 2147483647, %v861_v19  ;;  %vm867_vm6 = vweird.f32 %v861_v19 }
  0xd9   : > { %1945 = vrcp.f32 %v962_v20  ;;  %v974_v38 = vand.u32 2147483648, %v962_v20  ;;  %v972_v40 = vand.u32 2147483647, %v962_v20  ;;  %vm968_vm8 = vweird.f32 %v962_v20 }
  0xda   : > { %1947 = vrcp.f32 %v2132_v22  ;;  %v874_v41 = vor.u32 1.1754944e-38, %v873_v31  ;;  %vm872_vm9 = vcmp.eq.f32.partialorder %v871_v35, 8.507059e+37 }
  0xdb   : > { %v975_v46 = vor.u32 1.1754944e-38, %v974_v38  ;;  %vm973_vm11 = vcmp.eq.f32.partialorder %v972_v40, 8.507059e+37 }
  0xde   : > { %v1944_v24 = vpop.eup %1943 }
  0xdf   : > { %v1946_v26 = vpop.eup %1945  ;;  %v863_v27 = vmul.f32 %v1944_v24, %v861_v19  ;;  %vm868_vm4 = vweird.f32 %v1944_v24  ;;  %v1938_v19 = vld [vmem:[%s2360_s10] ss:$0 sm:$0xff] }
  0xe0   : > { %v964_v29 = vmul.f32 %v1946_v26, %v962_v20  ;;  %v1948_v33 = vpop.eup %1947  ;;  %vm969_vm5 = vweird.f32 %v1946_v26  ;;  %vm869_vm7 = vmor %vm867_vm6, %vm868_vm4 }
  0xe1   : > { %v864_v30 = vsub.f32 1.0, %v863_v27  ;;  %v987_v43 = vmul.f32 8.0, %v1948_v33  ;;  %vm970_vm10 = vmor %vm968_vm8, %vm969_vm5  ;;  %vm991_vm12 = vweird.f32 %v1948_v33 }
  0xe2   : > { %v965_v32 = vsub.f32 1.0, %v964_v29 }
  0xe3   : > { %v865_v34 = vmul.f32 %v1944_v24, %v864_v30  ;;  %v988_v50 = vsub.f32 1.0, %v987_v43  ;;  %v1166_v3 = vpop.f32.mrf.mxu1 }
  0xe4   : > { %v966_v37 = vmul.f32 %v1946_v26, %v965_v32  ;;  %v1170_v7 = vperm.slane %v1166_v3, 0 }
  0xe5   : > { %v866_v39 = vadd.f32 %v1944_v24, %v865_v34  ;;  %v989_v54 = vmul.f32 %v1948_v33, %v988_v50 }
  0xe6   : > { %v967_v42 = vadd.f32 %v1946_v26, %v966_v37 }
  0xe7   : > { %v870_v44 = vsel %vm869_vm7, %v1944_v24, %v866_v39  ;;  %v990_v57 = vadd.f32 %v1948_v33, %v989_v54 }
  0xe8   : > { %v875_v45 = vsel %vm872_vm9, %v874_v41, %v870_v44  ;;  %v971_v47 = vsel %vm970_vm10, %v1946_v26, %v967_v42 }
  0xe9   : > { %v877_v48 = vmul.f32 %v875_v45, %v2318_v6  ;;  %v976_v49 = vsel %vm973_vm11, %v975_v46, %v971_v47  ;;  %v992_v60 = vsel %vm991_vm12, %v1948_v33, %v990_v57  ;;  %v1863_v6 = vld [vmem:[#allocation7] sm:$0xff] }
  0xea   : > { %1314 = vmatpush.bf16.msrb.mxu3 %v1863_v6 }
  0xeb   : > { %v978_v51 = vmul.f32 %v976_v49, %v877_v48  ;;  %v1168_v4 = vpop.f32.mrf.mxu1 }
  0xed   : > { %v1074_v52 = vpack.c.bf16 %v978_v51, %v978_v51  ;;  %v980_v53 = vrot.slane %v978_v51, 4  ;;  %979 = vst [vmem:[%s598_s30] sm:$0xff] %v978_v51 }
  0xef   : > { %1227 = vmatmul.bf16.vlgmr.msrb.gmra.mxu2 %v1074_v52  ;;  %v981_v55 = vadd.f32 %v980_v53, %v978_v51 }
  0xf1   : > { %v982_v56 = vrot.slane %v981_v55, 2 }
  0xf3   : > { %v983_v58 = vadd.f32 %v982_v56, %v981_v55 }
  0xf5   : > { %v984_v59 = vrot.slane %v983_v58, 1 }
  0xf7   : > { %v985_v61 = vadd.f32 %v984_v59, %v983_v58 }
  0xf9   : > { %v993_v62 = vmul.f32 %v992_v60, %v985_v61 }
  0xfb   : > { %v994_v63 = vpack.c.bf16 %v993_v62, %v993_v62 }
  0xfd   : > { %1068 = vmatmul.bf16.vlgmr.msrb.gmra.mxu0 %v994_v63 }
 0x172   : > { %v1228_v9 = vpop.f32.mrf.mxu2 }
 0x173   : > { %v1229_v10 = vadd.f32 %v1228_v9, %v1170_v7 }
 0x175   : > { %v1236_v11 = vadd.f32 %v1937_v8, %v1229_v10 }
 0x177   : > { %v1237_v12 = vmax.f32 %v1236_v11, 0.0 }
 0x179   : > { %v1238_v14 = vpack.c.bf16 %v1237_v12, %v1237_v12 }
 0x17a   : > { %v1069_v15 = vpop.f32.mrf.mxu0  ;;  %v1230_v16 = vpop.f32.mrf.mxu2 }
 0x17b   : > { %v1070_v17 = vadd.f32 %v1069_v15, %v1011_v13  ;;  %1315 = vmatmul.bf16.vlgmr.msrb.gmra.mxu3 %v1238_v14 }
 0x17d   : > { %1073 = vst [vmem:[%s605_s6] sm:$0x1] %v1070_v17 }
 0x182   : > { %v1071_v18 = vpop.f32.mrf.mxu0 }
 0x1fe   : > { %v1316_v20 = vpop.f32.mrf.mxu3 }
 0x1ff   : > { %v1317_v21 = vadd.f32 %v1938_v19, %v1316_v20 }
 0x201   : > { %v1320_v22 = vand.u32 2147483647, %v1317_v21  ;;  %vm1324_vm0 = vcmp.ge.f32.partialorder %v1317_v21, 0.0  ;;  %v1342_v41 = vmax.f32 %v1317_v21, 0.0 }
 0x203   : > { %v1321_v23 = vsub.f32 0.0, %v1320_v22 }
 0x205   : > { %v1322_v24 = vmul.f32 1.442695, %v1321_v23 }
 0x206   : > { %v1318_v26 = vpop.f32.mrf.mxu3 }
 0x207   : > { %1949 = vpow2.f32 %v1322_v24 }
 0x20d   : > { %v1950_v27 = vpop.eup %1949 }
 0x20e   : > { %v1326_v28 = vadd.f32 1.0, %v1950_v27  ;;  %v1325_v42 = vsel %vm1324_vm0, 1.0, %v1950_v27 }
 0x210   : > { %1951 = vrcp.f32 %v1326_v28  ;;  %v1338_v33 = vand.u32 2147483648, %v1326_v28  ;;  %v1336_v35 = vand.u32 2147483647, %v1326_v28  ;;  %vm1332_vm14 = vweird.f32 %v1326_v28 }
 0x211   : > { %1953 = vlog2.f32 %v1326_v28 }
 0x212   : > { %v1339_v39 = vor.u32 1.1754944e-38, %v1338_v33  ;;  %vm1337_vm1 = vcmp.eq.f32.partialorder %v1336_v35, 8.507059e+37 }
 0x216   : > { %v1952_v29 = vpop.eup %1951 }
 0x217   : > { %v1328_v30 = vmul.f32 %v1952_v29, %v1326_v28  ;;  %v1954_v32 = vpop.eup %1953  ;;  %vm1333_vm13 = vweird.f32 %v1952_v29 }
 0x218   : > { %v1344_v38 = vmul.f32 0.6931472, %v1954_v32  ;;  %vm1334_vm15 = vmor %vm1332_vm14, %vm1333_vm13 }
 0x219   : > { %v1329_v31 = vsub.f32 1.0, %v1328_v30 }
 0x21a   : > { %v1345_v45 = vadd.f32 %v1344_v38, %v1342_v41 }
 0x21b   : > { %v1330_v34 = vmul.f32 %v1952_v29, %v1329_v31 }
 0x21d   : > { %v1331_v37 = vadd.f32 %v1952_v29, %v1330_v34 }
 0x21f   : > { %v1335_v40 = vsel %vm1334_vm15, %v1952_v29, %v1331_v37 }
 0x220   : > { %v1340_v43 = vsel %vm1337_vm1, %v1339_v39, %v1335_v40 }
 0x221   : > { %v1341_v44 = vmul.f32 %v1340_v43, %v1325_v42 }
 0x223   : > { %v1349_v25 = vsel %vm1348_vm2, %v1345_v45, %v1341_v44 }
 0x224   : > { %1350 = vst [vmem:[%s602_s16] sm:$0xff] %v1349_v25 }
 0x225 PF: > { %s2378_s21 = sld [smem:[#allocation13_spill]] }
 0x22b   : > { %s29_s18 = sadd.s32 1, %s2378_s21  }
 0x22c   : > { %p26_p7 = scmp.ge.s32.totalorder %s29_s18, 4  }
 0x22e   :  { %28 = sbr.rel (!%p26_p7) target bundleno = 8 (0x8), region = 152 }
 0x233   :  { %1396 = vsyncpa [#allocation3], 1 }
 0x234   :  { %1398 = vsyncpa [#allocation3 + $0x1], 1 }
 0x235   :  { %1399 = vsyncpa [#allocation5], 1 }
 0x236   :  { %1400 = vsyncpa [#allocation8], 1 }

// kernel: clean_tts_forward.3
= control target key start
LH: loop header
LB: loop body
LE: loop exit
PB: predicated region body
PF: predicated region fallthrough
CT: control target
= control target key end

     0   :  { %s2469_s0 = inlined_call_operand.vmem [shape: s32[2,16,4], index: 0, kind: input, shape index: {}]   ;;  %s2470_s1 = inlined_call_operand.vmem [shape: f32[2,1,128], index: 1, kind: input, shape index: {}]   ;;  %s2471_s2 = inlined_call_operand.hbm [shape: bf16[4,128,128], index: 2, kind: input, shape index: {}]   ;;  %s2472_s3 = inlined_call_operand.hbm [shape: bf16[3,128,128], index: 3, kind: input, shape index: {}]   ;;  %s2473_s4 = inlined_call_operand.vmem [shape: f32[1,128], index: 4, kind: input, shape index: {}]   ;;  %s2474_s5 = inlined_call_operand.hbm [shape: bf16[4,128,128], index: 5, kind: input, shape index: {}]   ;;  %s2475_s6 = inlined_call_operand.vmem [shape: f32[4,1,128], index: 6, kind: input, shape index: {}]   ;;  %s2476_s7 = inlined_call_operand.hbm [shape: f32[2,4,16,128], index: 7, kind: output, shape index: {}]  }
   0x1   :  { %2477 = sst [smem:[#allocation12_spill]] %s2471_s2 }
   0x2   :  { %12 = vsyncpa [#allocation3], 0 }
   0x3   :  { %13 = vsyncpa [#allocation6], 0 }
   0x4   :  { %14 = vsyncpa [#allocation4], 0 }
   0x5   :  { %16 = vsyncpa [#allocation4 + $0x1], 0  ;;  %s2306_s24 = smov 0   ;;  %s2308_s25 = smov 0  }
   0x6   :  { %s2310_s26 = smov 0   ;;  %s2312_s27 = smov 0  }
   0x7 LB: > { %s2327_s28 = sadd.s32 4294967295, %s2251_s27   ;;  %s1495_s29 = sadd.s32 4294967294, %s2251_s27   ;;  %s2251_s27 = sphi %s2312_s27, %s2486_s27   ;;  %s2247_s26 = sphi %s2310_s26, %s2485_s26   ;;  %s2243_s25 = sphi %s2308_s25, %s2484_s25   ;;  %s2239_s24 = sphi %s2306_s24, %s2483_s24  }
   0x8   : > { %s2331_s30 = sadd.s32 1, %s2251_s27   ;;  %s186_s8 = sadd.s32 1, %s2247_s26 }
   0x9   : > { %s183_s9 = ssub.s32 %s2251_s27, %s2331_s30  ;;  %p196_p0 = scmp.ne.s32.totalorder %s2247_s26, %s2243_s25 }
   0xa   : > { %p184_p1 = scmp.eq.s32.totalorder %s183_s9, 0  ;;  %p197_p2 = scmp.eq.s32.totalorder %s2327_s28, 1 }
   0xb   : > { %p202_p3 = scmp.ne.s32.totalorder %s2243_s25, %s2239_s24  ;;  %p203_p4 = scmp.eq.s32.totalorder %s1495_s29, 1 }
   0xc   : > { %s2342_s10 = scalar_select %p184_p1, %s2247_s26, %s186_s8  }
   0xd   : > { %p2344_p5 = por %p197_p2, %p196_p0  ;;  %p2348_p6 = por %p203_p4, %p202_p3 }
   0xe   : > { %p1496_p7 = scmp.ge.s32.totalorder %s2251_s27, 1  ;;  %p210_p8 = scmp.lt.s32.totalorder %s2251_s27, 3 }
   0xf   : > { %p2019_p9 = scmp.eq.s32.totalorder %s2327_s28, 0  ;;  %s235_s16 = sshll.u32 %s2472_s3, 4  ;;  %s236_s16 = int_to_ptr.hbm [resolvable:$true] %s235_s16 }
  0x10   : > { %p2355_p10 = pnand %p1496_p7, %p210_p8  ;;  %s2481_s2 = sld [smem:[#allocation12_spill]] }
  0x11   : > { %s2253_s21 = smov [#allocation5]   ;;  %s2254_s23 = smov 64  }
  0x12   : > { %p2005_p11 = pneg %p2355_p10  ;;  %s237_s22 = sshll.u32 %s2253_s21, 4  ;;  %s238_s22 = int_to_ptr.vmem [resolvable:$true] %s237_s22 }
  0x13   : > { %s2255_s29 = smov 4   ;;  %s2256_s8 = smov [#allocation2]  }
  0x14   : > { %p2369_p12 = pnand %p2019_p9, %p2005_p11  ;;  %s223_s9 = sshll.u32 %s2256_s8, 4  ;;  %s224_s9 = int_to_ptr.vmem [resolvable:$true] %s223_s9 }
  0x15   : > { %s252_s17 = sshll.u32 %s2474_s5, 4  ;;  %s2257_s18 = smov [#allocation7]   ;;  %s253_s17 = int_to_ptr.hbm [resolvable:$true] %s252_s17 }
  0x16   : > { %s221_s19 = sshll.u32 %s2481_s2, 4  ;;  %s254_s2 = sshll.u32 %s2257_s18, 4  ;;  %s222_s19 = int_to_ptr.hbm [resolvable:$true] %s221_s19  ;;  %s255_s2 = int_to_ptr.vmem [resolvable:$true] %s254_s2 }
  0x17   : > { %2011 = dma.hbm_to_vmem [thread:$0]  (!%p2369_p12), %s236_s16, 3072, %s238_s22, [#allocation6], %s2254_s23, %s2254_s23, %s2255_s29  }
  0x18   : > { %2008 = dma.hbm_to_vmem [thread:$0]  (!%p2369_p12), %s222_s19, 4096, %s224_s9, [#allocation3], %s2254_s23, %s2254_s23, %s2255_s29  }
  0x19   : > { %2014 = dma.hbm_to_vmem [thread:$0]  (!%p2369_p12), %s253_s17, 4096, %s255_s2, [#allocation6], %s2254_s23, %s2254_s23, %s2255_s29  }
  0x1a   : > { %287 = sbr.rel (%p2355_p10) target bundleno = 643 (0x283), region = 48 }
  0x1f   : > { %2226 = dma.done.wait (%p2019_p9), [#allocation3], 4096  }
  0x20   : > { %2228 = vsyncadd (%p2019_p9), [#allocation3], 4294963200 }
  0x21   : > { %2230 = dma.done.wait (%p2019_p9), [#allocation6], 7168  }
  0x22   : > { %2232 = vsyncadd (%p2019_p9), [#allocation6], 4294960128  ;;  %p333_p13 = scmp.lt.s32.totalorder %s2327_s28, 1  ;;  %v2258_v0 = vmov 3   ;;  %v2259_v1 = vmov 2   ;;  %v2260_v2 = vmov 0   ;;  %v343_v35 = vlaneseq }
  0x23   : > { %2072 = vset.pattern.permute.xlu1 %v2258_v0  ;;  %2071 = vset.pattern.permute.xlu0 %v2259_v1  ;;  %v1908_v4 = vld [vmem:[#allocation2 + $0x38] sm:$0xff]  ;;  %v1907_v7 = vld [vmem:[#allocation2 + $0x30] sm:$0xff]  ;;  %v1906_v12 = vld [vmem:[#allocation2 + $0x28] sm:$0xff]  ;;  %v2261_v20 = vmov 1   ;;  %v2262_v42 = vmov 1.0|1.0  }
  0x24   : > { %s2394_s2 = scalar_select %p333_p13, %s2327_s28, 1  ;;  %2073 = vset.pattern.permute.xlu2 %v2260_v2  ;;  %v1924_v5 = vld [vmem:[#allocation2 + $0xb8] sm:$0xff]  ;;  %514 = vmatpush.bf16.msra.mxu1 %v1908_v4  ;;  %v1923_v8 = vld [vmem:[#allocation2 + $0xb0] sm:$0xff]  ;;  %v1922_v13 = vld [vmem:[#allocation2 + $0xa8] sm:$0xff]  ;;  %v344_v38 = vand.u32 127, %v343_v35 }
  0x25   : > { %v1932_v6 = vld [vmem:[#allocation2 + $0xf8] sm:$0xff]  ;;  %606 = vmatpush.bf16.msra.mxu2 %v1924_v5  ;;  %v1931_v9 = vld [vmem:[#allocation2 + $0xf0] sm:$0xff]  ;;  %v1930_v14 = vld [vmem:[#allocation2 + $0xe8] sm:$0xff]  ;;  %s330_s15 = sand.u32 1, %s2243_s25   ;;  %s1989_s29 = sshll.u32 %s2327_s28, 6 }
  0x26   : > { %s1900_s13 = sshll.u32 %s2394_s2, 4  ;;  %700 = vmatpush.bf16.msra.mxu3 %v1932_v6  ;;  %v1916_v11 = vld [vmem:[#allocation2 + $0x78] sm:$0xff]  ;;  %s340_s23 = scalar_lea.vmem %s2470_s1, %s2394_s2  ;;  %v1915_v15 = vld [vmem:[#allocation2 + $0x70] sm:$0xff]  ;;  %v1905_v16 = vld [vmem:[#allocation2 + $0x20] sm:$0xff] }
  0x27   : > { %s337_s20 = scalar_lea.vmem %s2469_s0, %s1900_s13  ;;  %452 = vmatpush.bf16.msra.mxu0 %v1916_v11  ;;  %v1921_v17 = vld [vmem:[#allocation2 + $0xa0] sm:$0xff]  ;;  %v1904_v19 = vld [vmem:[#allocation2 + $0x18] sm:$0xff]  ;;  %v1903_v21 = vld [vmem:[#allocation2 + $0x10] sm:$0xff]  ;;  %s1505_s17 = sshll.u32 %s330_s15, 6 }
  0x28   : > { %v341_v3 = vld [vmem:[%s337_s20] sm:$0xff]  ;;  %v342_v10 = vld [vmem:[%s337_s20 + $0x8] sm:$0xff]  ;;  %515 = vmatpush.bf16.msra.mxu1 %v1907_v7  ;;  %v1920_v22 = vld [vmem:[#allocation2 + $0x98] sm:$0xff]  ;;  %s332_s19 = scalar_lea.vmem [#allocation8], %s1505_s17  ;;  %s1389_s14 = scalar_lea.hbm %s2476_s7, %s1989_s29 }
  0x29   : > { %623 = vperm.xlu1 %2072, %v341_v3   ;;  %529 = vperm.xlu0 %2071, %v341_v3   ;;  %v1929_v18 = vld [vmem:[#allocation2 + $0xe0] sm:$0xff]  ;;  %v1928_v23 = vld [vmem:[#allocation2 + $0xd8] sm:$0xff]  ;;  %v1914_v24 = vld [vmem:[#allocation2 + $0x68] sm:$0xff]  ;;  %s1390_s17 = sshll.u32 %s332_s19, 4  ;;  %s1392_s18 = sshll.u32 %s1389_s14, 4  ;;  %s1391_s17 = int_to_ptr.vmem [resolvable:$true] %s1390_s17  ;;  %s1393_s18 = int_to_ptr.hbm [resolvable:$true] %s1392_s18 }
  0x2a   : > { %346 = vperm.xlu2 %2073, %v341_v3   ;;  %607 = vmatpush.bf16.msra.mxu2 %v1923_v8  ;;  %v1902_v25 = vld [vmem:[#allocation2 + $0x8] sm:$0xff]  ;;  %v1919_v26 = vld [vmem:[#allocation2 + $0x90] sm:$0xff]  ;;  %v1913_v28 = vld [vmem:[#allocation2 + $0x60] sm:$0xff]  ;;  %s1378_s28 = scalar_lea.sflag [#allocation4], %s330_s15  ;;  %s2195_s2 = sshra.s32 %s1393_s18, 4  ;;  %s2196_s2 = int_to_ptr.hbm [resolvable:$true] %s2195_s2 }
  0x2b   : > { %701 = vmatpush.bf16.msra.mxu3 %v1931_v9  ;;  %453 = vmatpush.bf16.msra.mxu0 %v1915_v15  ;;  %v1927_v27 = vld [vmem:[#allocation2 + $0xd0] sm:$0xff]  ;;  %v1901_v29 = vld [vmem:[#allocation2] sm:$0xff]  ;;  %v1918_v30 = vld [vmem:[#allocation2 + $0x88] sm:$0xff]  ;;  %s2197_s13 = scalar_lea.hbm %s2196_s2, 64  ;;  %s2201_s21 = scalar_lea.hbm %s2476_s7, 128 }
  0x2c   : > { %516 = vmatpush.bf16.msra.mxu1 %v1906_v12  ;;  %v1926_v31 = vld [vmem:[#allocation2 + $0xc8] sm:$0xff]  ;;  %v1912_v32 = vld [vmem:[#allocation2 + $0x58] sm:$0xff]  ;;  %v1917_v33 = vld [vmem:[#allocation2 + $0x80] sm:$0xff]  ;;  %p2198_p0 = scmp.ne.s32.totalorder %s2196_s2, %s2197_s13  ;;  %p2202_p3 = scmp.lt.s32.totalorder %s2196_s2, %s2476_s7 }
  0x2d   : > { %v1925_v34 = vld [vmem:[#allocation2 + $0xc0] sm:$0xff]  ;;  %v1911_v36 = vld [vmem:[#allocation2 + $0x50] sm:$0xff]  ;;  %v1910_v39 = vld [vmem:[#allocation2 + $0x48] sm:$0xff]  ;;  %p2203_p4 = scmp.lt.s32.totalorder %s2201_s21, %s2197_s13 }
  0x2e   : > { %608 = vmatpush.bf16.msra.mxu2 %v1922_v13  ;;  %v1909_v40 = vld [vmem:[#allocation2 + $0x40] sm:$0xff]  ;;  %v1948_v49 = vld [vmem:[#allocation5 + $0x78] sm:$0xff]  ;;  %v1947_v52 = vld [vmem:[#allocation5 + $0x70] sm:$0xff]  ;;  %p2199_p1 = pnand %p2198_p0, %p2344_p5 }
  0x2f   : > { %702 = vmatpush.bf16.msra.mxu3 %v1930_v14  ;;  %454 = vmatpush.bf16.msra.mxu0 %v1914_v24  ;;  %v1940_v50 = vld [vmem:[#allocation5 + $0x38] sm:$0xff]  ;;  %v1939_v53 = vld [vmem:[#allocation5 + $0x30] sm:$0xff]  ;;  %v1946_v55 = vld [vmem:[#allocation5 + $0x68] sm:$0xff]  ;;  %p2204_p7 = por %p2203_p4, %p2202_p3 }
  0x30   : > { %517 = vmatpush.bf16.msra.mxu1 %v1905_v16  ;;  %v1956_v51 = vld [vmem:[#allocation5 + $0xb8] sm:$0xff]  ;;  %v1955_v54 = vld [vmem:[#allocation5 + $0xb0] sm:$0xff]  ;;  %v1938_v56 = vld [vmem:[#allocation5 + $0x28] sm:$0xff]  ;;  %p2200_p2 = pneg %p2199_p1 }
  0x31   : > { %626 = vperm.xlu1 %2072, %v342_v10   ;;  %532 = vperm.xlu0 %2071, %v342_v10   ;;  %v1954_v57 = vld [vmem:[#allocation5 + $0xa8] sm:$0xff]  ;;  %v1945_v58 = vld [vmem:[#allocation5 + $0x60] sm:$0xff]  ;;  %v1944_v61 = vld [vmem:[#allocation5 + $0x58] sm:$0xff] }
  0x32   : > { %349 = vperm.xlu2 %2073, %v342_v10   ;;  %609 = vmatpush.bf16.msra.mxu2 %v1921_v17  ;;  %v1937_v59 = vld [vmem:[#allocation5 + $0x20] sm:$0xff]  ;;  %v1936_v62 = vld [vmem:[#allocation5 + $0x18] sm:$0xff]  ;;  %v1935_v1 = vld [vmem:[#allocation5 + $0x10] sm:$0xff]  ;;  %p2205_p8 = pnand %p2204_p7, %p2200_p2 }
  0x33   : > { %703 = vmatpush.bf16.msra.mxu3 %v1929_v18  ;;  %455 = vmatpush.bf16.msra.mxu0 %v1913_v28  ;;  %v1953_v60 = vld [vmem:[#allocation5 + $0xa0] sm:$0xff]  ;;  %v1952_v63 = vld [vmem:[#allocation5 + $0x98] sm:$0xff]  ;;  %v1951_v2 = vld [vmem:[#allocation5 + $0x90] sm:$0xff] }
  0x34   : > { %518 = vmatpush.bf16.msra.mxu1 %v1904_v19  ;;  %v1934_v4 = vld [vmem:[#allocation5 + $0x8] sm:$0xff]  ;;  %v1941_v6 = vld [vmem:[#allocation5 + $0x40] sm:$0xff]  ;;  %v724_v19 = vshrl.u32 %v343_v35, 7 }
  0x35   : > { %v1950_v5 = vld [vmem:[#allocation5 + $0x88] sm:$0xff]  ;;  %v1933_v7 = vld [vmem:[#allocation5] sm:$0xff] }
  0x36   : > { %610 = vmatpush.bf16.msra.mxu2 %v1920_v22  ;;  %v1949_v8 = vld [vmem:[#allocation5 + $0x80] sm:$0xff]  ;;  %vm728_vm12 = vcmp.lt.s32.totalorder %v724_v19, 1  ;;  %vm902_vm14 = vcmp.lt.s32.totalorder %v724_v19, 7 }
  0x37   : > { %704 = vmatpush.bf16.msra.mxu3 %v1928_v23  ;;  %456 = vmatpush.bf16.msra.mxu0 %v1912_v32  ;;  %v2077_v17 = vld [vmem:[%s340_s23] ss:$0 sm:$0xff]  ;;  %vm1684_vm13 = vmneg %vm728_vm12 }
  0x38   : > { %519 = vmatpush.bf16.msra.mxu1 %v1903_v21 }
  0x39   : > { %2075 = vset.pattern.permute.xlu1 %v2261_v20  ;;  %2074 = vset.pattern.permute.xlu0 %v2261_v20 }
  0x3a   : > { %378 = vperm.xlu1 %2075, %v342_v10   ;;  %375 = vperm.xlu0 %2074, %v341_v3   ;;  %v1942_v3 = vld [vmem:[#allocation5 + $0x48] sm:$0xff] }
  0x3b   : > { %611 = vmatpush.bf16.msra.mxu2 %v1919_v26  ;;  %705 = vmatpush.bf16.msra.mxu3 %v1927_v27 }
  0x3c   : > { %520 = vmatpush.bf16.msra.mxu1 %v1902_v25  ;;  %457 = vmatpush.bf16.msra.mxu0 %v1911_v36  ;;  %v725_v25 = vadd.s32 8, %v724_v19  ;;  %v1981_v19 = vld [vmem:[#allocation7 + $0xc0] sm:$0xff] }
  0x3e   : > { %vm1990_vm15 = vcmp.lt.s32.totalorder %v725_v25, 15 }
  0x3f   : > { %612 = vmatpush.bf16.msra.mxu2 %v1918_v30  ;;  %706 = vmatpush.bf16.msra.mxu3 %v1926_v31 }
  0x40   : > { %521 = vmatpush.bf16.msra.mxu1 %v1901_v29  ;;  %458 = vmatpush.bf16.msra.mxu0 %v1910_v39  ;;  %v1964_v39 = vld [vmem:[#allocation7 + $0x38] sm:$0xff] }
  0x42   : > { %2076 = vset.pattern.permute.xlu0 %v2258_v0  ;;  %v1943_v0 = vld [vmem:[#allocation5 + $0x50] sm:$0xff] }
  0x43   : > { %613 = vmatpush.bf16.msra.mxu2 %v1917_v33  ;;  %707 = vmatpush.bf16.msra.mxu3 %v1925_v34 }
  0x44   : > { %459 = vmatpush.bf16.msra.mxu0 %v1909_v40  ;;  %884 = vmatpush.bf16.msrb.mxu1 %v1948_v49  ;;  %v1972_v40 = vld [vmem:[#allocation7 + $0x78] sm:$0xff]  ;;  %v1978_v49 = vld [vmem:[#allocation7 + $0xa8] sm:$0xff] }
  0x47   : > { %975 = vmatpush.bf16.msrb.mxu2 %v1956_v51  ;;  %1100 = vmatpush.bf16.msrb.mxu3 %v1964_v39  ;;  %v2078_v51 = vld [vmem:[%s2473_s4] ss:$0 sm:$0xff] }
  0x48   : > { %799 = vmatpush.bf16.msrb.mxu0 %v1940_v50  ;;  %885 = vmatpush.bf16.msrb.mxu1 %v1947_v52  ;;  %v1986_v50 = vld [vmem:[#allocation7 + $0xe8] sm:$0xff]  ;;  %v1961_v52 = vld [vmem:[#allocation7 + $0x20] sm:$0xff] }
  0x4b   : > { %976 = vmatpush.bf16.msrb.mxu2 %v1955_v54  ;;  %v1977_v54 = vld [vmem:[#allocation7 + $0xa0] sm:$0xff] }
  0x4c   : > { %800 = vmatpush.bf16.msrb.mxu0 %v1939_v53  ;;  %886 = vmatpush.bf16.msrb.mxu1 %v1946_v55  ;;  %v1969_v53 = vld [vmem:[#allocation7 + $0x60] sm:$0xff] }
  0x4d   : > { %v1985_v55 = vld [vmem:[#allocation7 + $0xe0] sm:$0xff] }
  0x4f   : > { %977 = vmatpush.bf16.msrb.mxu2 %v1954_v57 }
  0x50   : > { %801 = vmatpush.bf16.msrb.mxu0 %v1938_v56  ;;  %887 = vmatpush.bf16.msrb.mxu1 %v1945_v58  ;;  %v1960_v58 = vld [vmem:[#allocation7 + $0x18] sm:$0xff] }
  0x53   : > { %978 = vmatpush.bf16.msrb.mxu2 %v1953_v60  ;;  %v1976_v60 = vld [vmem:[#allocation7 + $0x98] sm:$0xff] }
  0x54   : > { %802 = vmatpush.bf16.msrb.mxu0 %v1937_v59  ;;  %888 = vmatpush.bf16.msrb.mxu1 %v1944_v61  ;;  %v1968_v59 = vld [vmem:[#allocation7 + $0x58] sm:$0xff] }
  0x57   : > { %979 = vmatpush.bf16.msrb.mxu2 %v1952_v63 }
  0x58   : > { %803 = vmatpush.bf16.msrb.mxu0 %v1936_v62  ;;  %889 = vmatpush.bf16.msrb.mxu1 %v1943_v0  ;;  %v1984_v62 = vld [vmem:[#allocation7 + $0xd8] sm:$0xff]  ;;  %v1959_v0 = vld [vmem:[#allocation7 + $0x10] sm:$0xff] }
  0x5b   : > { %980 = vmatpush.bf16.msrb.mxu2 %v1951_v2  ;;  %v1975_v2 = vld [vmem:[#allocation7 + $0x90] sm:$0xff] }
  0x5c   : > { %804 = vmatpush.bf16.msrb.mxu0 %v1935_v1  ;;  %890 = vmatpush.bf16.msrb.mxu1 %v1942_v3  ;;  %v1967_v1 = vld [vmem:[#allocation7 + $0x50] sm:$0xff] }
  0x5f   : > { %981 = vmatpush.bf16.msrb.mxu2 %v1950_v5 }
  0x60   : > { %805 = vmatpush.bf16.msrb.mxu0 %v1934_v4  ;;  %891 = vmatpush.bf16.msrb.mxu1 %v1941_v6  ;;  %v1983_v4 = vld [vmem:[#allocation7 + $0xd0] sm:$0xff] }
  0x63   : > { %982 = vmatpush.bf16.msrb.mxu2 %v1949_v8 }
  0x64   : > { %806 = vmatpush.bf16.msrb.mxu0 %v1933_v7 }
  0x84   : > { %v347_v37 = vpop.permute.xlu2 %346 }
  0x85   : > { %vm351_vm0 = vcmp.eq.s32.totalorder %v344_v38, %v347_v37 }
  0x8c   : > { %v350_v41 = vpop.permute.xlu2 %349 }
  0x8d   : > { %vm352_vm1 = vcmp.eq.s32.totalorder %v344_v38, %v350_v41  ;;  %v1980_v41 = vld [vmem:[#allocation7 + $0xb8] sm:$0xff] }
  0x8e   : > { %vm1578_vm2 = vmpackc.low %vm352_vm1, %vm351_vm0  ;;  %vm2263_vm0 = vmmov 1  }
  0x8f   : > { %1579 = vmatmul.msk.bf16.vlgmr.msra.gmra.mxu1 %vm1578_vm2, %v2262_v42  ;;  %vm1685_vm1 = vmpackc.low %vm2263_vm0, %vm1684_vm13 }
  0x90   : > { %vm1753_vm2 = vmpackc.low %vm1990_vm15, %vm2263_vm0  ;;  %1273 = vmatpush.bf16.msra.mxu1 %v1980_v41 }
  0x9b   : > { %v624_v43 = vpop.permute.xlu1 %623  ;;  %v530_v44 = vpop.permute.xlu0 %529 }
  0x9c   : > { %vm628_vm3 = vcmp.eq.s32.totalorder %v344_v38, %v624_v43  ;;  %vm534_vm6 = vcmp.eq.s32.totalorder %v344_v38, %v530_v44  ;;  %v1963_v43 = vld [vmem:[#allocation7 + $0x30] sm:$0xff] }
  0x9d   : > { %v1971_v44 = vld [vmem:[#allocation7 + $0x70] sm:$0xff]  ;;  %1101 = vmatpush.bf16.msrb.mxu3 %v1963_v43 }
  0xa3   : > { %v627_v45 = vpop.permute.xlu1 %626  ;;  %v533_v46 = vpop.permute.xlu0 %532 }
  0xa4   : > { %vm629_vm4 = vcmp.eq.s32.totalorder %v344_v38, %v627_v45  ;;  %vm535_vm5 = vcmp.eq.s32.totalorder %v344_v38, %v533_v46  ;;  %v1979_v45 = vld [vmem:[#allocation7 + $0xb0] sm:$0xff] }
  0xa5   : > { %vm1650_vm7 = vmpackc.low %vm629_vm4, %vm628_vm3  ;;  %v1987_v46 = vld [vmem:[#allocation7 + $0xf0] sm:$0xff]  ;;  %1274 = vmatpush.bf16.msra.mxu1 %v1979_v45 }
  0xa6   : > { %vm1614_vm8 = vmpackc.low %vm535_vm5, %vm534_vm6  ;;  %1651 = vmatmul.msk.bf16.vlgmr.msra.gmra.mxu3 %vm1650_vm7, %v2262_v42 }
  0xa7   : > { %1615 = vmatmul.msk.bf16.vlgmr.msra.gmra.mxu2 %vm1614_vm8, %v2262_v42 }
  0xa9   : > { %1275 = vmatpush.bf16.msra.mxu1 %v1978_v49  ;;  %v2079_v49 = vld [vmem:[%s2475_s6 + $0x1] ss:$0 sm:$0xff] }
  0xac   : > { %v379_v47 = vpop.permute.xlu1 %378  ;;  %v376_v48 = vpop.permute.xlu0 %375 }
  0xad   : > { %vm381_vm9 = vcmp.eq.s32.totalorder %v344_v38, %v379_v47  ;;  %vm380_vm10 = vcmp.eq.s32.totalorder %v344_v38, %v376_v48  ;;  %v1962_v47 = vld [vmem:[#allocation7 + $0x28] sm:$0xff]  ;;  %1276 = vmatpush.bf16.msra.mxu1 %v1977_v54 }
  0xae   : > { %vm1544_vm11 = vmpackc.low %vm381_vm9, %vm380_vm10  ;;  %v1970_v48 = vld [vmem:[#allocation7 + $0x68] sm:$0xff]  ;;  %1102 = vmatpush.bf16.msrb.mxu3 %v1962_v47 }
  0xaf   : > { %1545 = vmatmul.msk.bf16.vlgmr.msra.gmra.mxu0 %vm1544_vm11, %v2262_v42  ;;  %v1988_v42 = vld [vmem:[#allocation7 + $0xf8] sm:$0xff] }
  0xb0   : > { %1186 = vmatpush.bf16.msra.mxu0 %v1972_v40  ;;  %1360 = vmatpush.bf16.msra.mxu2 %v1988_v42 }
  0xb1   : > { %1277 = vmatpush.bf16.msra.mxu1 %v1976_v60 }
  0xb2   : > { %1103 = vmatpush.bf16.msrb.mxu3 %v1961_v52 }
  0xb4   : > { %1187 = vmatpush.bf16.msra.mxu0 %v1971_v44  ;;  %1361 = vmatpush.bf16.msra.mxu2 %v1987_v46 }
  0xb5   : > { %1278 = vmatpush.bf16.msra.mxu1 %v1975_v2 }
  0xb6   : > { %1104 = vmatpush.bf16.msrb.mxu3 %v1960_v58 }
  0xb8   : > { %1188 = vmatpush.bf16.msra.mxu0 %v1970_v48  ;;  %1362 = vmatpush.bf16.msra.mxu2 %v1986_v50  ;;  %v2080_v50 = vld [vmem:[%s2475_s6 + $0x2] ss:$0 sm:$0xff] }
  0xba   : > { %1105 = vmatpush.bf16.msrb.mxu3 %v1959_v0 }
  0xbc   : > { %1189 = vmatpush.bf16.msra.mxu0 %v1969_v53  ;;  %1363 = vmatpush.bf16.msra.mxu2 %v1985_v55  ;;  %v2081_v55 = vld [vmem:[%s2475_s6] ss:$0 sm:$0xff] }
  0xc0   : > { %1190 = vmatpush.bf16.msra.mxu0 %v1968_v59  ;;  %1364 = vmatpush.bf16.msra.mxu2 %v1984_v62 }
  0xc4   : > { %1191 = vmatpush.bf16.msra.mxu0 %v1967_v1  ;;  %1365 = vmatpush.bf16.msra.mxu2 %v1983_v4 }
 0x10c   : > { %v523_v9 = vpop.f32.mrf.mxu1 }
 0x114   : > { %v525_v15 = vpop.f32.mrf.mxu1 }
 0x129   : > { %v709_v13 = vpop.f32.mrf.mxu3 }
 0x12a   : > { %v615_v10 = vpop.f32.mrf.mxu2 }
 0x12c   : > { %v461_v11 = vpop.f32.mrf.mxu0 }
 0x12d   : > { %v524_v12 = vadd.f32 %v523_v9, %v461_v11  ;;  %v1958_v9 = vld [vmem:[#allocation7 + $0x8] sm:$0xff] }
 0x12e   : > { %v1974_v11 = vld [vmem:[#allocation7 + $0x88] sm:$0xff]  ;;  %1106 = vmatpush.bf16.msrb.mxu3 %v1958_v9 }
 0x12f   : > { %v620_v14 = vadd.f32 %v615_v10, %v524_v12  ;;  %v1966_v10 = vld [vmem:[#allocation7 + $0x48] sm:$0xff]  ;;  %1279 = vmatpush.bf16.msra.mxu1 %v1974_v11 }
 0x130   : > { %v1982_v12 = vld [vmem:[#allocation7 + $0xc8] sm:$0xff]  ;;  %1192 = vmatpush.bf16.msra.mxu0 %v1966_v10 }
 0x131   : > { %v714_v16 = vadd.f32 %v709_v13, %v620_v14  ;;  %v711_v24 = vpop.f32.mrf.mxu3  ;;  %1366 = vmatpush.bf16.msra.mxu2 %v1982_v12 }
 0x132   : > { %v617_v21 = vpop.f32.mrf.mxu2 }
 0x133   : > { %v720_v23 = vadd.f32 %v2077_v17, %v714_v16  ;;  %v1965_v16 = vld [vmem:[#allocation7 + $0x40] sm:$0xff] }
 0x134   : > { %v463_v18 = vpop.f32.mrf.mxu0  ;;  %1193 = vmatpush.bf16.msra.mxu0 %v1965_v16 }
 0x135   : > { %v526_v20 = vadd.f32 %v525_v15, %v463_v18  ;;  %v726_v28 = vrot.slane %v720_v23, 7  ;;  %v900_v29 = vrot.slane %v720_v23, 1  ;;  %v1957_v15 = vld [vmem:[#allocation7] sm:$0xff]  ;;  %1367 = vmatpush.bf16.msra.mxu2 %v1981_v19 }
 0x136   : > { %1107 = vmatpush.bf16.msrb.mxu3 %v1957_v15 }
 0x137   : > { %v621_v22 = vadd.f32 %v617_v21, %v526_v20 }
 0x139   : > { %v715_v26 = vadd.f32 %v711_v24, %v621_v22 }
 0x13b   : > { %v721_v27 = vadd.f32 %v2077_v17, %v715_v26  ;;  %v1973_v17 = vld [vmem:[#allocation7 + $0x80] sm:$0xff] }
 0x13c   : > { %1280 = vmatpush.bf16.msra.mxu1 %v1973_v17 }
 0x13d   : > { %v727_v30 = vrot.slane %v721_v27, 7  ;;  %v901_v31 = vrot.slane %v721_v27, 1  ;;  %v818_v32 = vpack.c.bf16 %v721_v27, %v720_v23 }
 0x13f   : > { %892 = vmatmul.bf16.vlgmr.msrb.gmra.mxu1 %v818_v32  ;;  %v729_v33 = vsel %vm728_vm12, %v726_v28, %v727_v30  ;;  %v730_v34 = vsel %vm728_vm12, %v727_v30, %v726_v28  ;;  %v903_v35 = vsel %vm902_vm14, %v900_v29, %v901_v31  ;;  %v904_v36 = vsel %vm902_vm14, %v901_v31, %v900_v29 }
 0x140   : > { %v1686_v37 = vpack.c.bf16 %v729_v33, %v730_v34  ;;  %v1754_v38 = vpack.c.bf16 %v904_v36, %v903_v35 }
 0x142   : > { %1687 = vmatmul.msk.bf16.vlgmr.msrb.gmra.mxu0 %vm1685_vm1, %v1686_v37  ;;  %1755 = vmatmul.msk.bf16.vlgmr.msrb.gmra.mxu2 %vm1753_vm2, %v1754_v38 }
 0x1bc   : > { %v893_v61 = vpop.f32.mrf.mxu1 }
 0x1bf   : > { %v808_v56 = vpop.f32.mrf.mxu0 }
 0x1c0   : > { %v816_v57 = vadd.f32 %v2078_v51, %v808_v56  ;;  %v2082_v56 = vld [vmem:[%s2475_s6 + $0x3] ss:$0 sm:$0xff] }
 0x1c2   : > { %v898_v63 = vadd.f32 %v893_v61, %v816_v57 }
 0x1c4   : > { %v895_v13 = vpop.f32.mrf.mxu1 }
 0x1c5   : > { %v984_v3 = vpop.f32.mrf.mxu2 }
 0x1c6   : > { %v2417_v5 = vadd.f32 %v984_v3, %v898_v63 }
 0x1c7   : > { %v810_v6 = vpop.f32.mrf.mxu0 }
 0x1c8   : > { %v1756_v7 = vmul.f32 -1.442695, %v2417_v5  ;;  %v817_v8 = vadd.f32 %v2078_v51, %v810_v6 }
 0x1ca   : > { %2083 = vpow2.f32 %v1756_v7  ;;  %v899_v14 = vadd.f32 %v895_v13, %v817_v8 }
 0x1cd   : > { %v986_v18 = vpop.f32.mrf.mxu2 }
 0x1ce   : > { %v990_v20 = vadd.f32 %v986_v18, %v899_v14 }
 0x1d0   : > { %v2084_v21 = vpop.eup %2083  ;;  %v1757_v22 = vmul.f32 -1.442695, %v990_v20 }
 0x1d1   : > { %v997_v23 = vadd.f32 1.0, %v2084_v21 }
 0x1d2   : > { %2085 = vpow2.f32 %v1757_v22 }
 0x1d3   : > { %2087 = vrcp.f32 %v997_v23  ;;  %v1010_v33 = vand.u32 2147483648, %v997_v23  ;;  %vm1004_vm4 = vweird.f32 %v997_v23  ;;  %v1008_v34 = vand.u32 2147483647, %v997_v23 }
 0x1d5   : > { %v1011_v40 = vor.u32 1.1754944e-38, %v1010_v33  ;;  %vm1009_vm7 = vcmp.eq.f32.partialorder %v1008_v34, 8.507059e+37 }
 0x1d8   : > { %v2086_v24 = vpop.eup %2085 }
 0x1d9   : > { %v2088_v25 = vpop.eup %2087  ;;  %v998_v26 = vadd.f32 1.0, %v2086_v24 }
 0x1da   : > { %v1000_v27 = vmul.f32 %v2088_v25, %v997_v23  ;;  %vm1005_vm3 = vweird.f32 %v2088_v25 }
 0x1db   : > { %2089 = vrcp.f32 %v998_v26  ;;  %vm1006_vm5 = vmor %vm1004_vm4, %vm1005_vm3  ;;  %v1025_v36 = vand.u32 2147483648, %v998_v26  ;;  %v1023_v39 = vand.u32 2147483647, %v998_v26  ;;  %vm1019_vm8 = vweird.f32 %v998_v26 }
 0x1dc   : > { %v1001_v28 = vsub.f32 1.0, %v1000_v27 }
 0x1dd   : > { %v1026_v43 = vor.u32 1.1754944e-38, %v1025_v36  ;;  %vm1024_vm10 = vcmp.eq.f32.partialorder %v1023_v39, 8.507059e+37 }
 0x1de   : > { %v1002_v29 = vmul.f32 %v2088_v25, %v1001_v28 }
 0x1e0   : > { %v1003_v31 = vadd.f32 %v2088_v25, %v1002_v29 }
 0x1e1   : > { %v2090_v30 = vpop.eup %2089 }
 0x1e2   : > { %v1015_v32 = vmul.f32 %v2090_v30, %v998_v26  ;;  %v1007_v37 = vsel %vm1006_vm5, %v2088_v25, %v1003_v31  ;;  %vm1020_vm6 = vweird.f32 %v2090_v30 }
 0x1e3   : > { %v1012_v42 = vsel %vm1009_vm7, %v1011_v40, %v1007_v37  ;;  %vm1021_vm9 = vmor %vm1019_vm8, %vm1020_vm6 }
 0x1e4   : > { %v1016_v35 = vsub.f32 1.0, %v1015_v32  ;;  %v1029_v46 = vmul.f32 %v1012_v42, %v2417_v5 }
 0x1e6   : > { %v1017_v38 = vmul.f32 %v2090_v30, %v1016_v35 }
 0x1e8   : > { %v1018_v41 = vadd.f32 %v2090_v30, %v1017_v38 }
 0x1ea   : > { %v1022_v44 = vsel %vm1021_vm9, %v2090_v30, %v1018_v41 }
 0x1eb   : > { %v1027_v45 = vsel %vm1024_vm10, %v1026_v43, %v1022_v44 }
 0x1ec   : > { %v1030_v47 = vmul.f32 %v1027_v45, %v990_v20 }
 0x1ee   : > { %v1031_v48 = vpack.c.bf16 %v1030_v47, %v1029_v46 }
 0x1f0   : > { %1108 = vmatmul.bf16.vlgmr.msrb.gmra.mxu3 %v1031_v48  ;;  %1194 = vmatmul.bf16.vlgmr.msra.gmra.mxu0 %v1031_v48 }
 0x1f1   : > { %1281 = vmatmul.bf16.vlgmr.msra.gmra.mxu1 %v1031_v48  ;;  %1368 = vmatmul.bf16.vlgmr.msra.gmra.mxu2 %v1031_v48 }
 0x26d   : > { %v1195_v51 = vpop.f32.mrf.mxu0 }
 0x26e   : > { %v1196_v52 = vadd.f32 %v2079_v49, %v1195_v51  ;;  %v1282_v53 = vpop.f32.mrf.mxu1 }
 0x26f   : > { %v1283_v54 = vadd.f32 %v2080_v50, %v1282_v53 }
 0x270   : > { %1823 = vst [vmem:[%s332_s19 + $0x10] sm:$0xff] %v1196_v52 }
 0x271   : > { %1858 = vst [vmem:[%s332_s19 + $0x20] sm:$0xff] %v1283_v54 }
 0x273   : > { %v1109_v57 = vpop.f32.mrf.mxu3 }
 0x274   : > { %v1110_v58 = vadd.f32 %v2081_v55, %v1109_v57  ;;  %v1369_v59 = vpop.f32.mrf.mxu2 }
 0x275   : > { %v1370_v60 = vadd.f32 %v2082_v56, %v1369_v59  ;;  %v1197_v61 = vpop.f32.mrf.mxu0 }
 0x276   : > { %1114 = vst [vmem:[%s332_s19] sm:$0xff] %v1110_v58  ;;  %v1198_v62 = vadd.f32 %v2079_v49, %v1197_v61  ;;  %v1284_v63 = vpop.f32.mrf.mxu1 }
 0x277   : > { %1893 = vst [vmem:[%s332_s19 + $0x30] sm:$0xff] %v1370_v60  ;;  %v1285_v0 = vadd.f32 %v2080_v50, %v1284_v63 }
 0x278   : > { %1824 = vst [vmem:[%s332_s19 + $0x18] sm:$0xff] %v1198_v62 }
 0x279   : > { %1859 = vst [vmem:[%s332_s19 + $0x28] sm:$0xff] %v1285_v0 }
 0x27b   : > { %v1111_v1 = vpop.f32.mrf.mxu3 }
 0x27c   : > { %v1112_v2 = vadd.f32 %v2081_v55, %v1111_v1  ;;  %v1371_v3 = vpop.f32.mrf.mxu2 }
 0x27d   : > { %v1372_v4 = vadd.f32 %v2082_v56, %v1371_v3 }
 0x27e   : > { %1115 = vst [vmem:[%s332_s19 + $0x8] sm:$0xff] %v1112_v2 }
 0x27f   : > { %1894 = vst [vmem:[%s332_s19 + $0x38] sm:$0xff] %v1372_v4 }
 0x280   : > { %2208 = shalt.err (!%p2205_p8)
}
 0x281   : > { %s2264_s15 = smov 128   ;;  %s2265_s19 = smov 8  }
 0x282   : > { %2003 = dma.vmem_to_hbm [thread:$0]  (%p2344_p5), %s1391_s17, 1024, %s1393_s18, %s1378_s28, %s2264_s15, %s2264_s15, %s2265_s19  }
 0x283 PF: > { %p2025_p9 = scmp.ge.s32.totalorder %s2251_s27, 2  ;;  %s1407_s29 = sand.u32 1, %s2239_s24  }
 0x284   : > { %s1408_s8 = scalar_lea.sflag [#allocation4], %s1407_s29 }
 0x285   : > { %p2016_p10 = pnand %p2025_p9, %p2348_p6 }
 0x287   : > { %p2017_p11 = pneg %p2016_p10 }
 0x289   : > { %2234 = dma.done.wait (%p2017_p11), %s1408_s8, 1024  }
 0x28a   : > { %2236 = vsyncadd (%p2017_p11), %s1408_s8, 4294966272  ;;  %p19_p12 = scmp.ge.s32.totalorder %s2331_s30, 4   ;;  %s2483_s24 = smov %s2243_s25 }
 0x28b   : > { %s2484_s25 = smov %s2247_s26  ;;  %s2485_s26 = smov %s2342_s10 }
 0x28c   : > { %s2486_s27 = smov %s2331_s30  ;;  %21 = sbr.rel (!%p19_p12) target bundleno = 7 (0x7), region = 113 }
 0x291   :  { %1414 = vsyncpa [#allocation3], 1 }
 0x292   :  { %1416 = vsyncpa [#allocation3 + $0x1], 1 }
 0x293   :  { %1417 = vsyncpa [#allocation6], 1 }
 0x294   :  { %1418 = vsyncpa [#allocation4], 1 }
 0x295   :  { %1420 = vsyncpa [#allocation4 + $0x1], 1 }

</bundles_post_ra>
